<compile_context>
chip_gen: v6e
topology: v6e:2x2x1
jax: 0.10.0
libtpu: 0.0.40
codegen_flags: <defaults>
</compile_context>

<pallas_src>
import functools

import jax
import jax.numpy as jnp
from jax.experimental import pallas as pl
from jax.experimental.pallas import tpu as pltpu

BN_EPS = 1e-5


# ------------------------------ fused kernel ------------------------------- #

def _r2cl_fused_kernel(x_ref, m1_ref, b1_ref, m_ref, bias_ref, g_ref, bt_ref,
                       sud_ref, p_ref, o_ref, *, layers, t, inv_count):
    """Whole R2CL_block forward on a lane-dense (N*H, W*C) activation layout.

    x_ref    : (N*H, W*Cin)           f32   input, NHWC-flattened
    m1_ref   : (W*Cin, W*C)           bf16  block-diag matrix of the 1x1 conv
    b1_ref   : (1, W*C)               f32   1x1-conv bias, tiled over W
    m_ref    : (layers, 3*W*C, W*C)   bf16  stacked banded 3x3-conv matrices
                                            (rows: kh=0 | kh=1 | kh=2 taps)
    bias_ref : (layers, 1, W*C)       f32   conv bias, tiled over W
    g_ref    : (layers, 1, W*C)       f32   BN gamma, tiled over W
    bt_ref   : (layers, 1, W*C)       f32   BN beta, tiled over W
    sud_ref  : (2*N*H, N*H)           bf16  stacked row-shift up / down (0
                                            across image boundaries)
    p_ref    : (W*C, W*C)             f32   per-channel reduce+broadcast (0/1)
    o_ref    : (N*H, W*C)             f32   output
    """
    f32, bf16 = jnp.float32, jnp.bfloat16
    nh = sud_ref.shape[1]

    sud = sud_ref[...]
    p = p_ref[...]

    # ---- Conv_1x1 + ReLU (single lane-dense matmul) ----
    x16 = x_ref[...].astype(bf16)
    x0 = jnp.maximum(
        jnp.dot(x16, m1_ref[...], preferred_element_type=f32) + b1_ref[...],
        0.0)

    def conv_bn_relu(a, m_l, bias, gamma, beta):
        # 3x3 conv, pad=1: vertical taps (with H / image zero padding) via one
        # tiny 0/1 row-shift matmul; horizontal taps + channel mixing folded
        # into the stacked banded (3*W*C, W*C) matrix -> ONE K=3*W*C matmul.
        a16 = a.astype(bf16)
        ud = jnp.dot(sud, a16, preferred_element_type=f32).astype(bf16)
        lhs = jnp.concatenate([ud[:nh], a16, ud[nh:]], axis=1)   # (NH, 3*WC)
        acc = jnp.dot(lhs, m_l, preferred_element_type=f32) + bias

        # BatchNorm2d, training-mode biased batch stats over (N,H,W), in f32.
        # Per-channel reduce + broadcast in one matmul with the 0/1 matrix p.
        mean_w = jnp.dot(jnp.sum(acc, axis=0, keepdims=True), p,
                         preferred_element_type=f32) * inv_count
        cen = acc - mean_w
        var_w = jnp.dot(jnp.sum(cen * cen, axis=0, keepdims=True), p,
                        preferred_element_type=f32) * inv_count
        inv_w = jax.lax.rsqrt(var_w + BN_EPS)
        return jnp.maximum(cen * (gamma * inv_w) + beta, 0.0)   # BN + ReLU

    # ---- RCNN: `layers` Recurrent_blocks, each applies its conv 1+t times ----
    h = x0
    for l in range(layers):
        m_l = m_ref[l]
        bias, gamma, beta = bias_ref[l], g_ref[l], bt_ref[l]
        inp = h
        h = conv_bn_relu(inp, m_l, bias, gamma, beta)
        for _ in range(t):
            h = conv_bn_relu(inp + h, m_l, bias, gamma, beta)

    # ---- fused residual add (x + RCNN(x)) ----
    o_ref[...] = x0 + h


# --------------------------- module wrapper -------------------------------- #

def init_params(key, in_channels, out_channels, layers):
    keys = jax.random.split(key, 2 + 2 * layers)
    params = {
        # PyTorch layouts: w1 (Cout,Cin)  [from (Cout,Cin,1,1)],  b1 (Cout,)
        "w1": 0.2 * jax.random.normal(keys[0], (out_channels, in_channels),
                                      jnp.float32),
        "b1": 0.1 * jax.random.normal(keys[1], (out_channels,), jnp.float32),
        "blocks": [],
    }
    for l in range(layers):
        wk, bk = keys[2 + 2 * l], keys[3 + 2 * l]
        params["blocks"].append(dict(
            w=0.2 * jax.random.normal(wk, (out_channels, out_channels, 3, 3),
                                      jnp.float32),          # (Cout,Cin,3,3)
            b=0.1 * jax.random.normal(bk, (out_channels,), jnp.float32),
            gamma=jnp.ones((out_channels,), jnp.float32),     # BN default init
            beta=jnp.zeros((out_channels,), jnp.float32),
        ))
    return params


def r2cl_block_forward(x_nchw, params, t=2):
    N, Cin, H, W = x_nchw.shape
    Cout = params["w1"].shape[0]
    layers = len(params["blocks"])
    NH, WC = N * H, W * Cout

    # ----- derived, lane-dense operands (plain XLA, outside the kernel) -----
    # activation layout inside the kernel: rows = N*H, lanes = W*C
    x_ld = jnp.transpose(x_nchw, (0, 2, 3, 1)).reshape(NH, W * Cin)
    x_ld = x_ld.astype(jnp.float32)

    # 1x1 conv as a block-diagonal (W*Cin, W*Cout) matmul
    m1 = jnp.kron(jnp.eye(W, dtype=jnp.float32),
                  params["w1"].T).astype(jnp.bfloat16)
    b1_w = jnp.tile(params["b1"], W)[None, :]

    # per-layer 3x3 conv -> three banded (W*C, W*C) matrices (one per kh tap),
    # stacked along K to match lhs = [up | mid | dn]; W-direction zero padding
    # is implicit in the band structure.
    def conv3x3_lane_matrix(w):
        C = w.shape[0]
        wt = jnp.transpose(w, (2, 3, 1, 0))                 # (kh, kw, ci, co)
        wi = jnp.arange(W)[:, None]
        wo = jnp.arange(W)[None, :]
        dx = wi - wo + 1                                    # kw index
        valid = (dx >= 0) & (dx <= 2)
        m = wt[:, jnp.clip(dx, 0, 2)]                       # (3, W, W, C, C)
        m = jnp.where(valid[None, :, :, None, None], m, 0.0)
        m = jnp.transpose(m, (0, 1, 3, 2, 4)).reshape(3, W * C, W * C)
        return jnp.concatenate([m[0], m[1], m[2]], axis=0).astype(jnp.bfloat16)

    m_all = jnp.stack([conv3x3_lane_matrix(b["w"]) for b in params["blocks"]])
    bias_all = jnp.stack([jnp.tile(b["b"], W)[None, :]
                          for b in params["blocks"]])
    gamma_all = jnp.stack([jnp.tile(b["gamma"], W)[None, :]
                           for b in params["blocks"]])
    beta_all = jnp.stack([jnp.tile(b["beta"], W)[None, :]
                          for b in params["blocks"]])

    # row-shift matrices for the vertical taps (zero across image boundaries
    # -> implements the H-direction zero padding), stacked up/down.
    r = jnp.arange(NH)
    same_img = (r[:, None] // H) == (r[None, :] // H)
    s_up = (r[None, :] == r[:, None] - 1) & same_img
    s_dn = (r[None, :] == r[:, None] + 1) & same_img
    s_ud = jnp.concatenate([s_up, s_dn], axis=0).astype(jnp.bfloat16)

    # per-channel reduce + broadcast matrix for the BatchNorm statistics
    col = jnp.arange(WC)
    p = (col[:, None] % Cout == col[None, :] % Cout).astype(jnp.float32)

    kernel = functools.partial(_r2cl_fused_kernel, layers=layers, t=t,
                               inv_count=1.0 / float(N * H * W))
    out = pl.pallas_call(
        kernel,
        out_shape=jax.ShapeDtypeStruct((NH, WC), jnp.float32),
        in_specs=[pl.BlockSpec(memory_space=pltpu.MemorySpace.VMEM)] * 9,
        out_specs=pl.BlockSpec(memory_space=pltpu.MemorySpace.VMEM),
    )(x_ld, m1, b1_w, m_all, bias_all, gamma_all, beta_all, s_ud, p)

    # lane-dense (N*H, W*C) -> NCHW
    return jnp.transpose(out.reshape(N, H, W, Cout), (0, 3, 1, 2))


# --------------------------- pure-JAX reference ----------------------------- #

def reference_forward(x_nchw, params, t=2):
    def conv_bn_relu(a, blk):
        y = jax.lax.conv_general_dilated(
            a, blk["w"], (1, 1), ((1, 1), (1, 1)),
            dimension_numbers=("NCHW", "OIHW", "NCHW"))
        y = y + blk["b"][None, :, None, None]
        mean = jnp.mean(y, axis=(0, 2, 3), keepdims=True)
        var = jnp.mean((y - mean) ** 2, axis=(0, 2, 3), keepdims=True)
        y = (blk["gamma"][None, :, None, None] * (y - mean)
             * jax.lax.rsqrt(var + BN_EPS) + blk["beta"][None, :, None, None])
        return jnp.maximum(y, 0.0)

    x = jax.lax.conv_general_dilated(
        x_nchw, params["w1"][:, :, None, None], (1, 1), ((0, 0), (0, 0)),
        dimension_numbers=("NCHW", "OIHW", "NCHW"))
    x = jnp.maximum(x + params["b1"][None, :, None, None], 0.0)

    h = x
    for blk in params["blocks"]:
        inp = h
        h = conv_bn_relu(inp, blk)
        for _ in range(t):
            h = conv_bn_relu(inp + h, blk)
    return x + h


# --------------------------------- main ------------------------------------ #

if __name__ == "__main__":
    N, Cin, Cout, H, W = 2, 4, 8, 16, 16      # W * Cout = 128 -> lane-full
    layers, t = 2, 2

    key = jax.random.PRNGKey(0)
    kx, kp = jax.random.split(key)
    x = jax.random.normal(kx, (N, Cin, H, W), jnp.float32)
    params = init_params(kp, Cin, Cout, layers)

    fwd = jax.jit(lambda xx: r2cl_block_forward(xx, params, t=t))
    out = fwd(x)
    jax.block_until_ready(out)

    assert out.shape == (N, Cout, H, W)
    assert bool(jnp.all(jnp.isfinite(out)))

    # loose tolerance: kernel uses bf16 matmul operands (f32 accumulation)
    ref = reference_forward(x, params, t=t)
    assert bool(jnp.allclose(out, ref, atol=1e-1, rtol=1e-1)), \
        float(jnp.max(jnp.abs(out - ref)))

    print("KERNEL_OK")
</pallas_src>

<mosaic_0001>
module attributes {stable_mosaic.version = 11 : i64} {
  func.func @_r2cl_fused_kernel(%arg0: memref<32x64xf32, #tpu.memory_space<vmem>>, %arg1: memref<64x128xbf16, #tpu.memory_space<vmem>>, %arg2: memref<1x128xf32, #tpu.memory_space<vmem>>, %arg3: memref<2x384x128xbf16, #tpu.memory_space<vmem>>, %arg4: memref<2x1x128xf32, #tpu.memory_space<vmem>>, %arg5: memref<2x1x128xf32, #tpu.memory_space<vmem>>, %arg6: memref<2x1x128xf32, #tpu.memory_space<vmem>>, %arg7: memref<64x32xbf16, #tpu.memory_space<vmem>>, %arg8: memref<128x128xf32, #tpu.memory_space<vmem>>, %arg9: memref<32x128xf32, #tpu.memory_space<vmem>>) attributes {dimension_semantics = [], scalar_prefetch = 0 : i64, scratch_operands = 0 : i64, tpu.core_type = #tpu.core_type<tc>} {
    %c0 = arith.constant 0 : index
    %c0_0 = arith.constant 0 : index
    %0 = vector.load %arg7[%c0, %c0_0] : memref<64x32xbf16, #tpu.memory_space<vmem>>, vector<64x32xbf16>
    %c0_1 = arith.constant 0 : index
    %c0_2 = arith.constant 0 : index
    %1 = vector.load %arg8[%c0_1, %c0_2] : memref<128x128xf32, #tpu.memory_space<vmem>>, vector<128x128xf32>
    %c0_3 = arith.constant 0 : index
    %c0_4 = arith.constant 0 : index
    %2 = vector.load %arg0[%c0_3, %c0_4] : memref<32x64xf32, #tpu.memory_space<vmem>>, vector<32x64xf32>
    %3 = arith.truncf %2 : vector<32x64xf32> to vector<32x64xbf16>
    %c0_5 = arith.constant 0 : index
    %c0_6 = arith.constant 0 : index
    %4 = vector.load %arg1[%c0_5, %c0_6] : memref<64x128xbf16, #tpu.memory_space<vmem>>, vector<64x128xbf16>
    %cst = arith.constant dense<0.000000e+00> : vector<32x128xf32>
    %5 = tpu.matmul %3, %4, %cst {dimension_numbers = #tpu.dot_dimension_numbers<[1], [0], [0], [1], [0, 0, 1, 1], [], []>} : vector<32x64xbf16>, vector<64x128xbf16>, vector<32x128xf32> -> vector<32x128xf32>
    %c0_7 = arith.constant 0 : index
    %c0_8 = arith.constant 0 : index
    %6 = vector.load %arg2[%c0_7, %c0_8] : memref<1x128xf32, #tpu.memory_space<vmem>>, vector<1x128xf32>
    %7 = vector.broadcast %6 : vector<1x128xf32> to vector<32x128xf32>
    %8 = arith.addf %5, %7 : vector<32x128xf32>
    %cst_9 = arith.constant 0.000000e+00 : f32
    %9 = vector.broadcast %cst_9 : f32 to vector<32x128xf32>
    %10 = arith.maximumf %8, %9 : vector<32x128xf32>
    %c0_10 = arith.constant 0 : index
    %c0_11 = arith.constant 0 : index
    %c0_12 = arith.constant 0 : index
    %11 = vector.load %arg3[%c0_10, %c0_11, %c0_12] : memref<2x384x128xbf16, #tpu.memory_space<vmem>>, vector<1x384x128xbf16>
    %12 = vector.shape_cast %11 : vector<1x384x128xbf16> to vector<384x128xbf16>
    %c0_13 = arith.constant 0 : index
    %c0_14 = arith.constant 0 : index
    %c0_15 = arith.constant 0 : index
    %13 = vector.load %arg4[%c0_13, %c0_14, %c0_15] : memref<2x1x128xf32, #tpu.memory_space<vmem>>, vector<1x1x128xf32>
    %14 = vector.shape_cast %13 : vector<1x1x128xf32> to vector<1x128xf32>
    %c0_16 = arith.constant 0 : index
    %c0_17 = arith.constant 0 : index
    %c0_18 = arith.constant 0 : index
    %15 = vector.load %arg5[%c0_16, %c0_17, %c0_18] : memref<2x1x128xf32, #tpu.memory_space<vmem>>, vector<1x1x128xf32>
    %16 = vector.shape_cast %15 : vector<1x1x128xf32> to vector<1x128xf32>
    %c0_19 = arith.constant 0 : index
    %c0_20 = arith.constant 0 : index
    %c0_21 = arith.constant 0 : index
    %17 = vector.load %arg6[%c0_19, %c0_20, %c0_21] : memref<2x1x128xf32, #tpu.memory_space<vmem>>, vector<1x1x128xf32>
    %18 = vector.shape_cast %17 : vector<1x1x128xf32> to vector<1x128xf32>
    %19 = arith.truncf %10 : vector<32x128xf32> to vector<32x128xbf16>
    %cst_22 = arith.constant dense<0.000000e+00> : vector<64x128xf32>
    %20 = tpu.matmul %0, %19, %cst_22 {dimension_numbers = #tpu.dot_dimension_numbers<[1], [0], [0], [1], [0, 0, 1, 1], [], []>} : vector<64x32xbf16>, vector<32x128xbf16>, vector<64x128xf32> -> vector<64x128xf32>
    %21 = arith.truncf %20 : vector<64x128xf32> to vector<64x128xbf16>
    %22 = vector.extract_strided_slice %21 {offsets = [0, 0], sizes = [32, 128], strides = [1, 1]} : vector<64x128xbf16> to vector<32x128xbf16>
    %23 = vector.extract_strided_slice %21 {offsets = [32, 0], sizes = [32, 128], strides = [1, 1]} : vector<64x128xbf16> to vector<32x128xbf16>
    %24 = tpu.concatenate %22, %19, %23 in 1 : vector<32x128xbf16>, vector<32x128xbf16>, vector<32x128xbf16> -> vector<32x384xbf16>
    %cst_23 = arith.constant dense<0.000000e+00> : vector<32x128xf32>
    %25 = tpu.matmul %24, %12, %cst_23 {dimension_numbers = #tpu.dot_dimension_numbers<[1], [0], [0], [1], [0, 0, 1, 1], [], []>} : vector<32x384xbf16>, vector<384x128xbf16>, vector<32x128xf32> -> vector<32x128xf32>
    %26 = vector.broadcast %14 : vector<1x128xf32> to vector<32x128xf32>
    %27 = arith.addf %25, %26 : vector<32x128xf32>
    %cst_24 = arith.constant dense<0.000000e+00> : vector<128xf32>
    %28 = vector.multi_reduction <add>, %27, %cst_24 [0] : vector<32x128xf32> to vector<128xf32>
    %29 = vector.shape_cast %28 : vector<128xf32> to vector<1x128xf32>
    %cst_25 = arith.constant dense<0.000000e+00> : vector<1x128xf32>
    %30 = tpu.matmul %29, %1, %cst_25 {dimension_numbers = #tpu.dot_dimension_numbers<[1], [0], [0], [1], [0, 0, 1, 1], [], []>} : vector<1x128xf32>, vector<128x128xf32>, vector<1x128xf32> -> vector<1x128xf32>
    %cst_26 = arith.constant 0.001953125 : f32
    %31 = vector.broadcast %cst_26 : f32 to vector<1x128xf32>
    %32 = arith.mulf %30, %31 : vector<1x128xf32>
    %33 = vector.broadcast %32 : vector<1x128xf32> to vector<32x128xf32>
    %34 = arith.subf %27, %33 : vector<32x128xf32>
    %35 = arith.mulf %34, %34 : vector<32x128xf32>
    %cst_27 = arith.constant dense<0.000000e+00> : vector<128xf32>
    %36 = vector.multi_reduction <add>, %35, %cst_27 [0] : vector<32x128xf32> to vector<128xf32>
    %37 = vector.shape_cast %36 : vector<128xf32> to vector<1x128xf32>
    %cst_28 = arith.constant dense<0.000000e+00> : vector<1x128xf32>
    %38 = tpu.matmul %37, %1, %cst_28 {dimension_numbers = #tpu.dot_dimension_numbers<[1], [0], [0], [1], [0, 0, 1, 1], [], []>} : vector<1x128xf32>, vector<128x128xf32>, vector<1x128xf32> -> vector<1x128xf32>
    %cst_29 = arith.constant 0.001953125 : f32
    %39 = vector.broadcast %cst_29 : f32 to vector<1x128xf32>
    %40 = arith.mulf %38, %39 : vector<1x128xf32>
    %cst_30 = arith.constant 9.99999974E-6 : f32
    %41 = vector.broadcast %cst_30 : f32 to vector<1x128xf32>
    %42 = arith.addf %40, %41 : vector<1x128xf32>
    %43 = math.rsqrt %42 : vector<1x128xf32>
    %44 = arith.mulf %16, %43 : vector<1x128xf32>
    %45 = vector.broadcast %44 : vector<1x128xf32> to vector<32x128xf32>
    %46 = arith.mulf %34, %45 : vector<32x128xf32>
    %47 = vector.broadcast %18 : vector<1x128xf32> to vector<32x128xf32>
    %48 = arith.addf %46, %47 : vector<32x128xf32>
    %cst_31 = arith.constant 0.000000e+00 : f32
    %49 = vector.broadcast %cst_31 : f32 to vector<32x128xf32>
    %50 = arith.maximumf %48, %49 : vector<32x128xf32>
    %51 = arith.addf %10, %50 : vector<32x128xf32>
    %52 = arith.truncf %51 : vector<32x128xf32> to vector<32x128xbf16>
    %cst_32 = arith.constant dense<0.000000e+00> : vector<64x128xf32>
    %53 = tpu.matmul %0, %52, %cst_32 {dimension_numbers = #tpu.dot_dimension_numbers<[1], [0], [0], [1], [0, 0, 1, 1], [], []>} : vector<64x32xbf16>, vector<32x128xbf16>, vector<64x128xf32> -> vector<64x128xf32>
    %54 = arith.truncf %53 : vector<64x128xf32> to vector<64x128xbf16>
    %55 = vector.extract_strided_slice %54 {offsets = [0, 0], sizes = [32, 128], strides = [1, 1]} : vector<64x128xbf16> to vector<32x128xbf16>
    %56 = vector.extract_strided_slice %54 {offsets = [32, 0], sizes = [32, 128], strides = [1, 1]} : vector<64x128xbf16> to vector<32x128xbf16>
    %57 = tpu.concatenate %55, %52, %56 in 1 : vector<32x128xbf16>, vector<32x128xbf16>, vector<32x128xbf16> -> vector<32x384xbf16>
    %cst_33 = arith.constant dense<0.000000e+00> : vector<32x128xf32>
    %58 = tpu.matmul %57, %12, %cst_33 {dimension_numbers = #tpu.dot_dimension_numbers<[1], [0], [0], [1], [0, 0, 1, 1], [], []>} : vector<32x384xbf16>, vector<384x128xbf16>, vector<32x128xf32> -> vector<32x128xf32>
    %59 = vector.broadcast %14 : vector<1x128xf32> to vector<32x128xf32>
    %60 = arith.addf %58, %59 : vector<32x128xf32>
    %cst_34 = arith.constant dense<0.000000e+00> : vector<128xf32>
    %61 = vector.multi_reduction <add>, %60, %cst_34 [0] : vector<32x128xf32> to vector<128xf32>
    %62 = vector.shape_cast %61 : vector<128xf32> to vector<1x128xf32>
    %cst_35 = arith.constant dense<0.000000e+00> : vector<1x128xf32>
    %63 = tpu.matmul %62, %1, %cst_35 {dimension_numbers = #tpu.dot_dimension_numbers<[1], [0], [0], [1], [0, 0, 1, 1], [], []>} : vector<1x128xf32>, vector<128x128xf32>, vector<1x128xf32> -> vector<1x128xf32>
    %cst_36 = arith.constant 0.001953125 : f32
    %64 = vector.broadcast %cst_36 : f32 to vector<1x128xf32>
    %65 = arith.mulf %63, %64 : vector<1x128xf32>
    %66 = vector.broadcast %65 : vector<1x128xf32> to vector<32x128xf32>
    %67 = arith.subf %60, %66 : vector<32x128xf32>
    %68 = arith.mulf %67, %67 : vector<32x128xf32>
    %cst_37 = arith.constant dense<0.000000e+00> : vector<128xf32>
    %69 = vector.multi_reduction <add>, %68, %cst_37 [0] : vector<32x128xf32> to vector<128xf32>
    %70 = vector.shape_cast %69 : vector<128xf32> to vector<1x128xf32>
    %cst_38 = arith.constant dense<0.000000e+00> : vector<1x128xf32>
    %71 = tpu.matmul %70, %1, %cst_38 {dimension_numbers = #tpu.dot_dimension_numbers<[1], [0], [0], [1], [0, 0, 1, 1], [], []>} : vector<1x128xf32>, vector<128x128xf32>, vector<1x128xf32> -> vector<1x128xf32>
    %cst_39 = arith.constant 0.001953125 : f32
    %72 = vector.broadcast %cst_39 : f32 to vector<1x128xf32>
    %73 = arith.mulf %71, %72 : vector<1x128xf32>
    %cst_40 = arith.constant 9.99999974E-6 : f32
    %74 = vector.broadcast %cst_40 : f32 to vector<1x128xf32>
    %75 = arith.addf %73, %74 : vector<1x128xf32>
    %76 = math.rsqrt %75 : vector<1x128xf32>
    %77 = arith.mulf %16, %76 : vector<1x128xf32>
    %78 = vector.broadcast %77 : vector<1x128xf32> to vector<32x128xf32>
    %79 = arith.mulf %67, %78 : vector<32x128xf32>
    %80 = vector.broadcast %18 : vector<1x128xf32> to vector<32x128xf32>
    %81 = arith.addf %79, %80 : vector<32x128xf32>
    %cst_41 = arith.constant 0.000000e+00 : f32
    %82 = vector.broadcast %cst_41 : f32 to vector<32x128xf32>
    %83 = arith.maximumf %81, %82 : vector<32x128xf32>
    %84 = arith.addf %10, %83 : vector<32x128xf32>
    %85 = arith.truncf %84 : vector<32x128xf32> to vector<32x128xbf16>
    %cst_42 = arith.constant dense<0.000000e+00> : vector<64x128xf32>
    %86 = tpu.matmul %0, %85, %cst_42 {dimension_numbers = #tpu.dot_dimension_numbers<[1], [0], [0], [1], [0, 0, 1, 1], [], []>} : vector<64x32xbf16>, vector<32x128xbf16>, vector<64x128xf32> -> vector<64x128xf32>
    %87 = arith.truncf %86 : vector<64x128xf32> to vector<64x128xbf16>
    %88 = vector.extract_strided_slice %87 {offsets = [0, 0], sizes = [32, 128], strides = [1, 1]} : vector<64x128xbf16> to vector<32x128xbf16>
    %89 = vector.extract_strided_slice %87 {offsets = [32, 0], sizes = [32, 128], strides = [1, 1]} : vector<64x128xbf16> to vector<32x128xbf16>
    %90 = tpu.concatenate %88, %85, %89 in 1 : vector<32x128xbf16>, vector<32x128xbf16>, vector<32x128xbf16> -> vector<32x384xbf16>
    %cst_43 = arith.constant dense<0.000000e+00> : vector<32x128xf32>
    %91 = tpu.matmul %90, %12, %cst_43 {dimension_numbers = #tpu.dot_dimension_numbers<[1], [0], [0], [1], [0, 0, 1, 1], [], []>} : vector<32x384xbf16>, vector<384x128xbf16>, vector<32x128xf32> -> vector<32x128xf32>
    %92 = vector.broadcast %14 : vector<1x128xf32> to vector<32x128xf32>
    %93 = arith.addf %91, %92 : vector<32x128xf32>
    %cst_44 = arith.constant dense<0.000000e+00> : vector<128xf32>
    %94 = vector.multi_reduction <add>, %93, %cst_44 [0] : vector<32x128xf32> to vector<128xf32>
    %95 = vector.shape_cast %94 : vector<128xf32> to vector<1x128xf32>
    %cst_45 = arith.constant dense<0.000000e+00> : vector<1x128xf32>
    %96 = tpu.matmul %95, %1, %cst_45 {dimension_numbers = #tpu.dot_dimension_numbers<[1], [0], [0], [1], [0, 0, 1, 1], [], []>} : vector<1x128xf32>, vector<128x128xf32>, vector<1x128xf32> -> vector<1x128xf32>
    %cst_46 = arith.constant 0.001953125 : f32
    %97 = vector.broadcast %cst_46 : f32 to vector<1x128xf32>
    %98 = arith.mulf %96, %97 : vector<1x128xf32>
    %99 = vector.broadcast %98 : vector<1x128xf32> to vector<32x128xf32>
    %100 = arith.subf %93, %99 : vector<32x128xf32>
    %101 = arith.mulf %100, %100 : vector<32x128xf32>
    %cst_47 = arith.constant dense<0.000000e+00> : vector<128xf32>
    %102 = vector.multi_reduction <add>, %101, %cst_47 [0] : vector<32x128xf32> to vector<128xf32>
    %103 = vector.shape_cast %102 : vector<128xf32> to vector<1x128xf32>
    %cst_48 = arith.constant dense<0.000000e+00> : vector<1x128xf32>
    %104 = tpu.matmul %103, %1, %cst_48 {dimension_numbers = #tpu.dot_dimension_numbers<[1], [0], [0], [1], [0, 0, 1, 1], [], []>} : vector<1x128xf32>, vector<128x128xf32>, vector<1x128xf32> -> vector<1x128xf32>
    %cst_49 = arith.constant 0.001953125 : f32
    %105 = vector.broadcast %cst_49 : f32 to vector<1x128xf32>
    %106 = arith.mulf %104, %105 : vector<1x128xf32>
    %cst_50 = arith.constant 9.99999974E-6 : f32
    %107 = vector.broadcast %cst_50 : f32 to vector<1x128xf32>
    %108 = arith.addf %106, %107 : vector<1x128xf32>
    %109 = math.rsqrt %108 : vector<1x128xf32>
    %110 = arith.mulf %16, %109 : vector<1x128xf32>
    %111 = vector.broadcast %110 : vector<1x128xf32> to vector<32x128xf32>
    %112 = arith.mulf %100, %111 : vector<32x128xf32>
    %113 = vector.broadcast %18 : vector<1x128xf32> to vector<32x128xf32>
    %114 = arith.addf %112, %113 : vector<32x128xf32>
    %cst_51 = arith.constant 0.000000e+00 : f32
    %115 = vector.broadcast %cst_51 : f32 to vector<32x128xf32>
    %116 = arith.maximumf %114, %115 : vector<32x128xf32>
    %c1 = arith.constant 1 : index
    %c0_52 = arith.constant 0 : index
    %c0_53 = arith.constant 0 : index
    %117 = vector.load %arg3[%c1, %c0_52, %c0_53] : memref<2x384x128xbf16, #tpu.memory_space<vmem>>, vector<1x384x128xbf16>
    %118 = vector.shape_cast %117 : vector<1x384x128xbf16> to vector<384x128xbf16>
    %c1_54 = arith.constant 1 : index
    %c0_55 = arith.constant 0 : index
    %c0_56 = arith.constant 0 : index
    %119 = vector.load %arg4[%c1_54, %c0_55, %c0_56] : memref<2x1x128xf32, #tpu.memory_space<vmem>>, vector<1x1x128xf32>
    %120 = vector.shape_cast %119 : vector<1x1x128xf32> to vector<1x128xf32>
    %c1_57 = arith.constant 1 : index
    %c0_58 = arith.constant 0 : index
    %c0_59 = arith.constant 0 : index
    %121 = vector.load %arg5[%c1_57, %c0_58, %c0_59] : memref<2x1x128xf32, #tpu.memory_space<vmem>>, vector<1x1x128xf32>
    %122 = vector.shape_cast %121 : vector<1x1x128xf32> to vector<1x128xf32>
    %c1_60 = arith.constant 1 : index
    %c0_61 = arith.constant 0 : index
    %c0_62 = arith.constant 0 : index
    %123 = vector.load %arg6[%c1_60, %c0_61, %c0_62] : memref<2x1x128xf32, #tpu.memory_space<vmem>>, vector<1x1x128xf32>
    %124 = vector.shape_cast %123 : vector<1x1x128xf32> to vector<1x128xf32>
    %125 = arith.truncf %116 : vector<32x128xf32> to vector<32x128xbf16>
    %cst_63 = arith.constant dense<0.000000e+00> : vector<64x128xf32>
    %126 = tpu.matmul %0, %125, %cst_63 {dimension_numbers = #tpu.dot_dimension_numbers<[1], [0], [0], [1], [0, 0, 1, 1], [], []>} : vector<64x32xbf16>, vector<32x128xbf16>, vector<64x128xf32> -> vector<64x128xf32>
    %127 = arith.truncf %126 : vector<64x128xf32> to vector<64x128xbf16>
    %128 = vector.extract_strided_slice %127 {offsets = [0, 0], sizes = [32, 128], strides = [1, 1]} : vector<64x128xbf16> to vector<32x128xbf16>
    %129 = vector.extract_strided_slice %127 {offsets = [32, 0], sizes = [32, 128], strides = [1, 1]} : vector<64x128xbf16> to vector<32x128xbf16>
    %130 = tpu.concatenate %128, %125, %129 in 1 : vector<32x128xbf16>, vector<32x128xbf16>, vector<32x128xbf16> -> vector<32x384xbf16>
    %cst_64 = arith.constant dense<0.000000e+00> : vector<32x128xf32>
    %131 = tpu.matmul %130, %118, %cst_64 {dimension_numbers = #tpu.dot_dimension_numbers<[1], [0], [0], [1], [0, 0, 1, 1], [], []>} : vector<32x384xbf16>, vector<384x128xbf16>, vector<32x128xf32> -> vector<32x128xf32>
    %132 = vector.broadcast %120 : vector<1x128xf32> to vector<32x128xf32>
    %133 = arith.addf %131, %132 : vector<32x128xf32>
    %cst_65 = arith.constant dense<0.000000e+00> : vector<128xf32>
    %134 = vector.multi_reduction <add>, %133, %cst_65 [0] : vector<32x128xf32> to vector<128xf32>
    %135 = vector.shape_cast %134 : vector<128xf32> to vector<1x128xf32>
    %cst_66 = arith.constant dense<0.000000e+00> : vector<1x128xf32>
    %136 = tpu.matmul %135, %1, %cst_66 {dimension_numbers = #tpu.dot_dimension_numbers<[1], [0], [0], [1], [0, 0, 1, 1], [], []>} : vector<1x128xf32>, vector<128x128xf32>, vector<1x128xf32> -> vector<1x128xf32>
    %cst_67 = arith.constant 0.001953125 : f32
    %137 = vector.broadcast %cst_67 : f32 to vector<1x128xf32>
    %138 = arith.mulf %136, %137 : vector<1x128xf32>
    %139 = vector.broadcast %138 : vector<1x128xf32> to vector<32x128xf32>
    %140 = arith.subf %133, %139 : vector<32x128xf32>
    %141 = arith.mulf %140, %140 : vector<32x128xf32>
    %cst_68 = arith.constant dense<0.000000e+00> : vector<128xf32>
    %142 = vector.multi_reduction <add>, %141, %cst_68 [0] : vector<32x128xf32> to vector<128xf32>
    %143 = vector.shape_cast %142 : vector<128xf32> to vector<1x128xf32>
    %cst_69 = arith.constant dense<0.000000e+00> : vector<1x128xf32>
    %144 = tpu.matmul %143, %1, %cst_69 {dimension_numbers = #tpu.dot_dimension_numbers<[1], [0], [0], [1], [0, 0, 1, 1], [], []>} : vector<1x128xf32>, vector<128x128xf32>, vector<1x128xf32> -> vector<1x128xf32>
    %cst_70 = arith.constant 0.001953125 : f32
    %145 = vector.broadcast %cst_70 : f32 to vector<1x128xf32>
    %146 = arith.mulf %144, %145 : vector<1x128xf32>
    %cst_71 = arith.constant 9.99999974E-6 : f32
    %147 = vector.broadcast %cst_71 : f32 to vector<1x128xf32>
    %148 = arith.addf %146, %147 : vector<1x128xf32>
    %149 = math.rsqrt %148 : vector<1x128xf32>
    %150 = arith.mulf %122, %149 : vector<1x128xf32>
    %151 = vector.broadcast %150 : vector<1x128xf32> to vector<32x128xf32>
    %152 = arith.mulf %140, %151 : vector<32x128xf32>
    %153 = vector.broadcast %124 : vector<1x128xf32> to vector<32x128xf32>
    %154 = arith.addf %152, %153 : vector<32x128xf32>
    %cst_72 = arith.constant 0.000000e+00 : f32
    %155 = vector.broadcast %cst_72 : f32 to vector<32x128xf32>
    %156 = arith.maximumf %154, %155 : vector<32x128xf32>
    %157 = arith.addf %116, %156 : vector<32x128xf32>
    %158 = arith.truncf %157 : vector<32x128xf32> to vector<32x128xbf16>
    %cst_73 = arith.constant dense<0.000000e+00> : vector<64x128xf32>
    %159 = tpu.matmul %0, %158, %cst_73 {dimension_numbers = #tpu.dot_dimension_numbers<[1], [0], [0], [1], [0, 0, 1, 1], [], []>} : vector<64x32xbf16>, vector<32x128xbf16>, vector<64x128xf32> -> vector<64x128xf32>
    %160 = arith.truncf %159 : vector<64x128xf32> to vector<64x128xbf16>
    %161 = vector.extract_strided_slice %160 {offsets = [0, 0], sizes = [32, 128], strides = [1, 1]} : vector<64x128xbf16> to vector<32x128xbf16>
    %162 = vector.extract_strided_slice %160 {offsets = [32, 0], sizes = [32, 128], strides = [1, 1]} : vector<64x128xbf16> to vector<32x128xbf16>
    %163 = tpu.concatenate %161, %158, %162 in 1 : vector<32x128xbf16>, vector<32x128xbf16>, vector<32x128xbf16> -> vector<32x384xbf16>
    %cst_74 = arith.constant dense<0.000000e+00> : vector<32x128xf32>
    %164 = tpu.matmul %163, %118, %cst_74 {dimension_numbers = #tpu.dot_dimension_numbers<[1], [0], [0], [1], [0, 0, 1, 1], [], []>} : vector<32x384xbf16>, vector<384x128xbf16>, vector<32x128xf32> -> vector<32x128xf32>
    %165 = vector.broadcast %120 : vector<1x128xf32> to vector<32x128xf32>
    %166 = arith.addf %164, %165 : vector<32x128xf32>
    %cst_75 = arith.constant dense<0.000000e+00> : vector<128xf32>
    %167 = vector.multi_reduction <add>, %166, %cst_75 [0] : vector<32x128xf32> to vector<128xf32>
    %168 = vector.shape_cast %167 : vector<128xf32> to vector<1x128xf32>
    %cst_76 = arith.constant dense<0.000000e+00> : vector<1x128xf32>
    %169 = tpu.matmul %168, %1, %cst_76 {dimension_numbers = #tpu.dot_dimension_numbers<[1], [0], [0], [1], [0, 0, 1, 1], [], []>} : vector<1x128xf32>, vector<128x128xf32>, vector<1x128xf32> -> vector<1x128xf32>
    %cst_77 = arith.constant 0.001953125 : f32
    %170 = vector.broadcast %cst_77 : f32 to vector<1x128xf32>
    %171 = arith.mulf %169, %170 : vector<1x128xf32>
    %172 = vector.broadcast %171 : vector<1x128xf32> to vector<32x128xf32>
    %173 = arith.subf %166, %172 : vector<32x128xf32>
    %174 = arith.mulf %173, %173 : vector<32x128xf32>
    %cst_78 = arith.constant dense<0.000000e+00> : vector<128xf32>
    %175 = vector.multi_reduction <add>, %174, %cst_78 [0] : vector<32x128xf32> to vector<128xf32>
    %176 = vector.shape_cast %175 : vector<128xf32> to vector<1x128xf32>
    %cst_79 = arith.constant dense<0.000000e+00> : vector<1x128xf32>
    %177 = tpu.matmul %176, %1, %cst_79 {dimension_numbers = #tpu.dot_dimension_numbers<[1], [0], [0], [1], [0, 0, 1, 1], [], []>} : vector<1x128xf32>, vector<128x128xf32>, vector<1x128xf32> -> vector<1x128xf32>
    %cst_80 = arith.constant 0.001953125 : f32
    %178 = vector.broadcast %cst_80 : f32 to vector<1x128xf32>
    %179 = arith.mulf %177, %178 : vector<1x128xf32>
    %cst_81 = arith.constant 9.99999974E-6 : f32
    %180 = vector.broadcast %cst_81 : f32 to vector<1x128xf32>
    %181 = arith.addf %179, %180 : vector<1x128xf32>
    %182 = math.rsqrt %181 : vector<1x128xf32>
    %183 = arith.mulf %122, %182 : vector<1x128xf32>
    %184 = vector.broadcast %183 : vector<1x128xf32> to vector<32x128xf32>
    %185 = arith.mulf %173, %184 : vector<32x128xf32>
    %186 = vector.broadcast %124 : vector<1x128xf32> to vector<32x128xf32>
    %187 = arith.addf %185, %186 : vector<32x128xf32>
    %cst_82 = arith.constant 0.000000e+00 : f32
    %188 = vector.broadcast %cst_82 : f32 to vector<32x128xf32>
    %189 = arith.maximumf %187, %188 : vector<32x128xf32>
    %190 = arith.addf %116, %189 : vector<32x128xf32>
    %191 = arith.truncf %190 : vector<32x128xf32> to vector<32x128xbf16>
    %cst_83 = arith.constant dense<0.000000e+00> : vector<64x128xf32>
    %192 = tpu.matmul %0, %191, %cst_83 {dimension_numbers = #tpu.dot_dimension_numbers<[1], [0], [0], [1], [0, 0, 1, 1], [], []>} : vector<64x32xbf16>, vector<32x128xbf16>, vector<64x128xf32> -> vector<64x128xf32>
    %193 = arith.truncf %192 : vector<64x128xf32> to vector<64x128xbf16>
    %194 = vector.extract_strided_slice %193 {offsets = [0, 0], sizes = [32, 128], strides = [1, 1]} : vector<64x128xbf16> to vector<32x128xbf16>
    %195 = vector.extract_strided_slice %193 {offsets = [32, 0], sizes = [32, 128], strides = [1, 1]} : vector<64x128xbf16> to vector<32x128xbf16>
    %196 = tpu.concatenate %194, %191, %195 in 1 : vector<32x128xbf16>, vector<32x128xbf16>, vector<32x128xbf16> -> vector<32x384xbf16>
    %cst_84 = arith.constant dense<0.000000e+00> : vector<32x128xf32>
    %197 = tpu.matmul %196, %118, %cst_84 {dimension_numbers = #tpu.dot_dimension_numbers<[1], [0], [0], [1], [0, 0, 1, 1], [], []>} : vector<32x384xbf16>, vector<384x128xbf16>, vector<32x128xf32> -> vector<32x128xf32>
    %198 = vector.broadcast %120 : vector<1x128xf32> to vector<32x128xf32>
    %199 = arith.addf %197, %198 : vector<32x128xf32>
    %cst_85 = arith.constant dense<0.000000e+00> : vector<128xf32>
    %200 = vector.multi_reduction <add>, %199, %cst_85 [0] : vector<32x128xf32> to vector<128xf32>
    %201 = vector.shape_cast %200 : vector<128xf32> to vector<1x128xf32>
    %cst_86 = arith.constant dense<0.000000e+00> : vector<1x128xf32>
    %202 = tpu.matmul %201, %1, %cst_86 {dimension_numbers = #tpu.dot_dimension_numbers<[1], [0], [0], [1], [0, 0, 1, 1], [], []>} : vector<1x128xf32>, vector<128x128xf32>, vector<1x128xf32> -> vector<1x128xf32>
    %cst_87 = arith.constant 0.001953125 : f32
    %203 = vector.broadcast %cst_87 : f32 to vector<1x128xf32>
    %204 = arith.mulf %202, %203 : vector<1x128xf32>
    %205 = vector.broadcast %204 : vector<1x128xf32> to vector<32x128xf32>
    %206 = arith.subf %199, %205 : vector<32x128xf32>
    %207 = arith.mulf %206, %206 : vector<32x128xf32>
    %cst_88 = arith.constant dense<0.000000e+00> : vector<128xf32>
    %208 = vector.multi_reduction <add>, %207, %cst_88 [0] : vector<32x128xf32> to vector<128xf32>
    %209 = vector.shape_cast %208 : vector<128xf32> to vector<1x128xf32>
    %cst_89 = arith.constant dense<0.000000e+00> : vector<1x128xf32>
    %210 = tpu.matmul %209, %1, %cst_89 {dimension_numbers = #tpu.dot_dimension_numbers<[1], [0], [0], [1], [0, 0, 1, 1], [], []>} : vector<1x128xf32>, vector<128x128xf32>, vector<1x128xf32> -> vector<1x128xf32>
    %cst_90 = arith.constant 0.001953125 : f32
    %211 = vector.broadcast %cst_90 : f32 to vector<1x128xf32>
    %212 = arith.mulf %210, %211 : vector<1x128xf32>
    %cst_91 = arith.constant 9.99999974E-6 : f32
    %213 = vector.broadcast %cst_91 : f32 to vector<1x128xf32>
    %214 = arith.addf %212, %213 : vector<1x128xf32>
    %215 = math.rsqrt %214 : vector<1x128xf32>
    %216 = arith.mulf %122, %215 : vector<1x128xf32>
    %217 = vector.broadcast %216 : vector<1x128xf32> to vector<32x128xf32>
    %218 = arith.mulf %206, %217 : vector<32x128xf32>
    %219 = vector.broadcast %124 : vector<1x128xf32> to vector<32x128xf32>
    %220 = arith.addf %218, %219 : vector<32x128xf32>
    %cst_92 = arith.constant 0.000000e+00 : f32
    %221 = vector.broadcast %cst_92 : f32 to vector<32x128xf32>
    %222 = arith.maximumf %220, %221 : vector<32x128xf32>
    %223 = arith.addf %10, %222 : vector<32x128xf32>
    %c0_93 = arith.constant 0 : index
    %c0_94 = arith.constant 0 : index
    %224 = vector.load %arg9[%c0_93, %c0_94] : memref<32x128xf32, #tpu.memory_space<vmem>>, vector<32x128xf32>
    tpu.vector_store %arg9[%c0_93, %c0_94], %223 {strides = array<i32>} : memref<32x128xf32, #tpu.memory_space<vmem>>, vector<32x128xf32>,
    return
  }
}

</mosaic_0001>

<bundles_post_ra>
// kernel: tile.15
= control target key start
LH: loop header
LB: loop body
LE: loop exit
PB: predicated region body
PF: predicated region fallthrough
CT: control target
= control target key end

     0   :  { %s133_s10 = smov 120   ;;  %s134_s11 = smov 104   ;;  %vm3_vm0 = vcmask 64512   ;;  %vm9_vm1 = vcmask 1048512   ;;  %vm15_vm2 = vcmask 982912   ;;  %vm21_vm3 = vcmask 917312   ;;  %s209_s0 = inlined_call_operand.vmem [shape: f32[16,8], index: 0, kind: input, shape index: {}]   ;;  %s210_s1 = inlined_call_operand.vmem [shape: f32[1,128], index: 1, kind: output, shape index: {}]  }
   0x1   :  { %v103_v0 = vld [vmem:[%s209_s0 + $0xf] sm:$0x1]   ;;  %v105_v1 = vld [vmem:[%s209_s0 + $0xd] sm:$0x1]   ;;  %v104_v2 = vld [vmem:[%s209_s0 + $0xe] sm:$0x1]  }
   0x2   :  { %7 = vrot.lane.b32.xlu0 %v103_v0, %s133_s10  ;;  %19 = vrot.lane.b32.xlu1 %v105_v1, %s134_s11  ;;  %v106_v3 = vld [vmem:[%s209_s0 + $0xc] sm:$0x1]   ;;  %s135_s16 = smov 112   ;;  %s136_s17 = smov 96   ;;  %v107_v4 = vld [vmem:[%s209_s0 + $0xb] sm:$0x1]  }
   0x3   :  { %v108_v5 = vld [vmem:[%s209_s0 + $0xa] sm:$0x1]   ;;  %v2_v6 = vld [vmem:[%s209_s0] sm:$0x1]   ;;  %s137_s24 = smov 88   ;;  %s138_s25 = smov 80  }
   0x4   :  { %4 = vst.msk [vmem:[#allocation0] sm:$0x1] %vm3_vm0, %v2_v6   ;;  %v109_v7 = vld [vmem:[%s209_s0 + $0x9] sm:$0x1]   ;;  %v110_v8 = vld [vmem:[%s209_s0 + $0x8] sm:$0x1]  }
   0x5   :  { %s139_s30 = smov 72   ;;  %s140_s2 = smov 64   ;;  %v111_v9 = vld [vmem:[%s209_s0 + $0x7] sm:$0x1]   ;;  %v112_v10 = vld [vmem:[%s209_s0 + $0x6] sm:$0x1]  }
   0x6   :  { %13 = vrot.lane.b32.xlu0 %v104_v2, %s135_s16  ;;  %25 = vrot.lane.b32.xlu1 %v106_v3, %s136_s17  ;;  %s141_s7 = smov 56   ;;  %s142_s8 = smov 48   ;;  %v113_v11 = vld [vmem:[%s209_s0 + $0x5] sm:$0x1]   ;;  %v114_v12 = vld [vmem:[%s209_s0 + $0x4] sm:$0x1]  }
   0x7   :  { %s143_s13 = smov 40   ;;  %s144_s14 = smov 32   ;;  %v115_v13 = vld [vmem:[%s209_s0 + $0x3] sm:$0x1]   ;;  %v116_v14 = vld [vmem:[%s209_s0 + $0x2] sm:$0x1]  }
   0x8   :  { %s145_s19 = smov 24   ;;  %s146_s20 = smov 16   ;;  %v117_v15 = vld [vmem:[%s209_s0 + $0x1] sm:$0x1]   ;;  %vm27_vm4 = vcmask 851712   ;;  %vm33_vm5 = vcmask 786112  }
   0x9   :  { %s147_s0 = smov 8   ;;  %vm39_vm6 = vcmask 720512   ;;  %vm45_vm7 = vcmask 654912   ;;  %vm51_vm8 = vcmask 589312   ;;  %vm57_vm9 = vcmask 523712  }
   0xa   :  { %31 = vrot.lane.b32.xlu0 %v107_v4, %s137_s24  ;;  %37 = vrot.lane.b32.xlu1 %v108_v5, %s138_s25  ;;  %vm63_vm10 = vcmask 458112   ;;  %vm69_vm11 = vcmask 392512   ;;  %vm75_vm12 = vcmask 326912   ;;  %vm81_vm13 = vcmask 261312  }
   0xb   :  { %vm87_vm14 = vcmask 195712   ;;  %vm93_vm15 = vcmask 130112  }
   0xe   :  { %43 = vrot.lane.b32.xlu0 %v109_v7, %s139_s30  ;;  %49 = vrot.lane.b32.xlu1 %v110_v8, %s140_s2 }
  0x12   :  { %55 = vrot.lane.b32.xlu0 %v111_v9, %s141_s7  ;;  %61 = vrot.lane.b32.xlu1 %v112_v10, %s142_s8 }
  0x16   :  { %67 = vrot.lane.b32.xlu0 %v113_v11, %s143_s13  ;;  %73 = vrot.lane.b32.xlu1 %v114_v12, %s144_s14 }
  0x1a   :  { %79 = vrot.lane.b32.xlu0 %v115_v13, %s145_s19  ;;  %85 = vrot.lane.b32.xlu1 %v116_v14, %s146_s20 }
  0x1e   :  { %91 = vrot.lane.b32.xlu0 %v117_v15, %s147_s0 }
  0x74   :  { %v8_v16 = vpop.permute.xlu0 %7   ;;  %v20_v17 = vpop.permute.xlu1 %19  }
  0x75   :  { %10 = vst.msk [vmem:[#allocation0] sm:$0x1] %vm9_vm1, %v8_v16  }
  0x78   :  { %v14_v18 = vpop.permute.xlu0 %13   ;;  %v26_v19 = vpop.permute.xlu1 %25  }
  0x79   :  { %16 = vst.msk [vmem:[#allocation0] sm:$0x1] %vm15_vm2, %v14_v18  }
  0x7a   :  { %22 = vst.msk [vmem:[#allocation0] sm:$0x1] %vm21_vm3, %v20_v17  }
  0x7b   :  { %28 = vst.msk [vmem:[#allocation0] sm:$0x1] %vm27_vm4, %v26_v19  }
  0x7c   :  { %v32_v20 = vpop.permute.xlu0 %31   ;;  %v38_v21 = vpop.permute.xlu1 %37  }
  0x7d   :  { %34 = vst.msk [vmem:[#allocation0] sm:$0x1] %vm33_vm5, %v32_v20  }
  0x7e   :  { %40 = vst.msk [vmem:[#allocation0] sm:$0x1] %vm39_vm6, %v38_v21  }
  0x80   :  { %v44_v22 = vpop.permute.xlu0 %43   ;;  %v50_v23 = vpop.permute.xlu1 %49  }
  0x81   :  { %46 = vst.msk [vmem:[#allocation0] sm:$0x1] %vm45_vm7, %v44_v22  }
  0x82   :  { %52 = vst.msk [vmem:[#allocation0] sm:$0x1] %vm51_vm8, %v50_v23  }
  0x84   :  { %v56_v24 = vpop.permute.xlu0 %55   ;;  %v62_v25 = vpop.permute.xlu1 %61  }
  0x85   :  { %58 = vst.msk [vmem:[#allocation0] sm:$0x1] %vm57_vm9, %v56_v24  }
  0x86   :  { %64 = vst.msk [vmem:[#allocation0] sm:$0x1] %vm63_vm10, %v62_v25  }
  0x88   :  { %v68_v26 = vpop.permute.xlu0 %67   ;;  %v74_v27 = vpop.permute.xlu1 %73  }
  0x89   :  { %70 = vst.msk [vmem:[#allocation0] sm:$0x1] %vm69_vm11, %v68_v26  }
  0x8a   :  { %76 = vst.msk [vmem:[#allocation0] sm:$0x1] %vm75_vm12, %v74_v27  }
  0x8c   :  { %v80_v28 = vpop.permute.xlu0 %79   ;;  %v86_v29 = vpop.permute.xlu1 %85  }
  0x8d   :  { %82 = vst.msk [vmem:[#allocation0] sm:$0x1] %vm81_vm13, %v80_v28  }
  0x8e   :  { %88 = vst.msk [vmem:[#allocation0] sm:$0x1] %vm87_vm14, %v86_v29  }
  0x90   :  { %v92_v30 = vpop.permute.xlu0 %91  }
  0x91   :  { %94 = vst.msk [vmem:[#allocation0] sm:$0x1] %vm93_vm15, %v92_v30  }
  0x98   :  { %v99_v31 = vld [vmem:[#allocation0] sm:$0x1] }
  0x99   :  { %102 = vst [vmem:[%s210_s1] sm:$0x1] %v99_v31 }

// kernel: tile.14
= control target key start
LH: loop header
LB: loop body
LE: loop exit
PB: predicated region body
PF: predicated region fallthrough
CT: control target
= control target key end

     0   :  { %2 = vsyncpa [#allocation1], 0  ;;  %s45_s6 = smov [#allocation0]   ;;  %s65_s0 = inlined_call_operand.hbm [shape: f32[8], index: 0, kind: input, shape index: {}]   ;;  %s66_s1 = inlined_call_operand.vmem [shape: f32[16,8], index: 1, kind: output, shape index: {}]  }
   0x1   :  { %s9_s7 = sshll.u32 %s45_s6, 4  ;;  %s10_s7 = int_to_ptr.vmem [resolvable:$true] %s9_s7 }
   0x2   :  { %s31_s8 = scalar_lea.vmem %s10_s7, 16  ;;  %s35_s9 = scalar_lea.vmem %s10_s7, 32 }
   0x3   :  { %p32_p0 = scmp.ne.s32.totalorder %s10_s7, %s31_s8  ;;  %p36_p1 = scmp.lt.s32.totalorder %s10_s7, %s10_s7 }
   0x4   :  { %p37_p2 = scmp.lt.s32.totalorder %s35_s9, %s31_s8 }
   0x6   :  { %p38_p3 = por %p37_p2, %p36_p1 }
   0x8   :  { %p39_p4 = pnand %p38_p3, %p32_p0 }
   0xa   :  { %42 = shalt.err (!%p39_p4)
}
   0xb   :  { %12 = dma.hbm_to_vmem [thread:$0]  %s65_s0, 16, %s10_s7, [#allocation1]  }
   0xc   :  { %43 = dma.done.wait [#allocation1], 16  }
   0xd   :  { %44 = vsyncadd [#allocation1], 4294967280  ;;  %v16_v0 = vld [vmem:[#allocation0] ss:$0 sm:$0xff] }
   0xe   :  { %17 = vst [vmem:[%s66_s1] sm:$0xff] %v16_v0  ;;  %21 = vst [vmem:[%s66_s1 + $0x8] sm:$0xff] %v16_v0 }
   0xf   :  { %20 = vsyncpa [#allocation1], 1 }

// kernel: tile.22
= control target key start
LH: loop header
LB: loop body
LE: loop exit
PB: predicated region body
PF: predicated region fallthrough
CT: control target
= control target key end

     0   :  { %s133_s10 = smov 120   ;;  %s134_s11 = smov 104   ;;  %vm3_vm0 = vcmask 64512   ;;  %vm9_vm1 = vcmask 1048512   ;;  %vm15_vm2 = vcmask 982912   ;;  %vm21_vm3 = vcmask 917312   ;;  %s209_s0 = inlined_call_operand.vmem [shape: f32[16,8], index: 0, kind: input, shape index: {}]   ;;  %s210_s1 = inlined_call_operand.vmem [shape: f32[1,1,128], index: 1, kind: output, shape index: {}]  }
   0x1   :  { %v103_v0 = vld [vmem:[%s209_s0 + $0xf] sm:$0x1]   ;;  %v105_v1 = vld [vmem:[%s209_s0 + $0xd] sm:$0x1]   ;;  %v104_v2 = vld [vmem:[%s209_s0 + $0xe] sm:$0x1]  }
   0x2   :  { %7 = vrot.lane.b32.xlu0 %v103_v0, %s133_s10  ;;  %19 = vrot.lane.b32.xlu1 %v105_v1, %s134_s11  ;;  %v106_v3 = vld [vmem:[%s209_s0 + $0xc] sm:$0x1]   ;;  %s135_s16 = smov 112   ;;  %s136_s17 = smov 96   ;;  %v107_v4 = vld [vmem:[%s209_s0 + $0xb] sm:$0x1]  }
   0x3   :  { %v108_v5 = vld [vmem:[%s209_s0 + $0xa] sm:$0x1]   ;;  %v2_v6 = vld [vmem:[%s209_s0] sm:$0x1]   ;;  %s137_s24 = smov 88   ;;  %s138_s25 = smov 80  }
   0x4   :  { %4 = vst.msk [vmem:[#allocation0] sm:$0x1] %vm3_vm0, %v2_v6   ;;  %v109_v7 = vld [vmem:[%s209_s0 + $0x9] sm:$0x1]   ;;  %v110_v8 = vld [vmem:[%s209_s0 + $0x8] sm:$0x1]  }
   0x5   :  { %s139_s30 = smov 72   ;;  %s140_s2 = smov 64   ;;  %v111_v9 = vld [vmem:[%s209_s0 + $0x7] sm:$0x1]   ;;  %v112_v10 = vld [vmem:[%s209_s0 + $0x6] sm:$0x1]  }
   0x6   :  { %13 = vrot.lane.b32.xlu0 %v104_v2, %s135_s16  ;;  %25 = vrot.lane.b32.xlu1 %v106_v3, %s136_s17  ;;  %s141_s7 = smov 56   ;;  %s142_s8 = smov 48   ;;  %v113_v11 = vld [vmem:[%s209_s0 + $0x5] sm:$0x1]   ;;  %v114_v12 = vld [vmem:[%s209_s0 + $0x4] sm:$0x1]  }
   0x7   :  { %s143_s13 = smov 40   ;;  %s144_s14 = smov 32   ;;  %v115_v13 = vld [vmem:[%s209_s0 + $0x3] sm:$0x1]   ;;  %v116_v14 = vld [vmem:[%s209_s0 + $0x2] sm:$0x1]  }
   0x8   :  { %s145_s19 = smov 24   ;;  %s146_s20 = smov 16   ;;  %v117_v15 = vld [vmem:[%s209_s0 + $0x1] sm:$0x1]   ;;  %vm27_vm4 = vcmask 851712   ;;  %vm33_vm5 = vcmask 786112  }
   0x9   :  { %s147_s0 = smov 8   ;;  %vm39_vm6 = vcmask 720512   ;;  %vm45_vm7 = vcmask 654912   ;;  %vm51_vm8 = vcmask 589312   ;;  %vm57_vm9 = vcmask 523712  }
   0xa   :  { %31 = vrot.lane.b32.xlu0 %v107_v4, %s137_s24  ;;  %37 = vrot.lane.b32.xlu1 %v108_v5, %s138_s25  ;;  %vm63_vm10 = vcmask 458112   ;;  %vm69_vm11 = vcmask 392512   ;;  %vm75_vm12 = vcmask 326912   ;;  %vm81_vm13 = vcmask 261312  }
   0xb   :  { %vm87_vm14 = vcmask 195712   ;;  %vm93_vm15 = vcmask 130112  }
   0xe   :  { %43 = vrot.lane.b32.xlu0 %v109_v7, %s139_s30  ;;  %49 = vrot.lane.b32.xlu1 %v110_v8, %s140_s2 }
  0x12   :  { %55 = vrot.lane.b32.xlu0 %v111_v9, %s141_s7  ;;  %61 = vrot.lane.b32.xlu1 %v112_v10, %s142_s8 }
  0x16   :  { %67 = vrot.lane.b32.xlu0 %v113_v11, %s143_s13  ;;  %73 = vrot.lane.b32.xlu1 %v114_v12, %s144_s14 }
  0x1a   :  { %79 = vrot.lane.b32.xlu0 %v115_v13, %s145_s19  ;;  %85 = vrot.lane.b32.xlu1 %v116_v14, %s146_s20 }
  0x1e   :  { %91 = vrot.lane.b32.xlu0 %v117_v15, %s147_s0 }
  0x74   :  { %v8_v16 = vpop.permute.xlu0 %7   ;;  %v20_v17 = vpop.permute.xlu1 %19  }
  0x75   :  { %10 = vst.msk [vmem:[#allocation0] sm:$0x1] %vm9_vm1, %v8_v16  }
  0x78   :  { %v14_v18 = vpop.permute.xlu0 %13   ;;  %v26_v19 = vpop.permute.xlu1 %25  }
  0x79   :  { %16 = vst.msk [vmem:[#allocation0] sm:$0x1] %vm15_vm2, %v14_v18  }
  0x7a   :  { %22 = vst.msk [vmem:[#allocation0] sm:$0x1] %vm21_vm3, %v20_v17  }
  0x7b   :  { %28 = vst.msk [vmem:[#allocation0] sm:$0x1] %vm27_vm4, %v26_v19  }
  0x7c   :  { %v32_v20 = vpop.permute.xlu0 %31   ;;  %v38_v21 = vpop.permute.xlu1 %37  }
  0x7d   :  { %34 = vst.msk [vmem:[#allocation0] sm:$0x1] %vm33_vm5, %v32_v20  }
  0x7e   :  { %40 = vst.msk [vmem:[#allocation0] sm:$0x1] %vm39_vm6, %v38_v21  }
  0x80   :  { %v44_v22 = vpop.permute.xlu0 %43   ;;  %v50_v23 = vpop.permute.xlu1 %49  }
  0x81   :  { %46 = vst.msk [vmem:[#allocation0] sm:$0x1] %vm45_vm7, %v44_v22  }
  0x82   :  { %52 = vst.msk [vmem:[#allocation0] sm:$0x1] %vm51_vm8, %v50_v23  }
  0x84   :  { %v56_v24 = vpop.permute.xlu0 %55   ;;  %v62_v25 = vpop.permute.xlu1 %61  }
  0x85   :  { %58 = vst.msk [vmem:[#allocation0] sm:$0x1] %vm57_vm9, %v56_v24  }
  0x86   :  { %64 = vst.msk [vmem:[#allocation0] sm:$0x1] %vm63_vm10, %v62_v25  }
  0x88   :  { %v68_v26 = vpop.permute.xlu0 %67   ;;  %v74_v27 = vpop.permute.xlu1 %73  }
  0x89   :  { %70 = vst.msk [vmem:[#allocation0] sm:$0x1] %vm69_vm11, %v68_v26  }
  0x8a   :  { %76 = vst.msk [vmem:[#allocation0] sm:$0x1] %vm75_vm12, %v74_v27  }
  0x8c   :  { %v80_v28 = vpop.permute.xlu0 %79   ;;  %v86_v29 = vpop.permute.xlu1 %85  }
  0x8d   :  { %82 = vst.msk [vmem:[#allocation0] sm:$0x1] %vm81_vm13, %v80_v28  }
  0x8e   :  { %88 = vst.msk [vmem:[#allocation0] sm:$0x1] %vm87_vm14, %v86_v29  }
  0x90   :  { %v92_v30 = vpop.permute.xlu0 %91  }
  0x91   :  { %94 = vst.msk [vmem:[#allocation0] sm:$0x1] %vm93_vm15, %v92_v30  }
  0x98   :  { %v99_v31 = vld [vmem:[#allocation0] sm:$0x1] }
  0x99   :  { %102 = vst [vmem:[%s210_s1] sm:$0x1] %v99_v31 }

// kernel: _lambda_.1
= control target key start
LH: loop header
LB: loop body
LE: loop exit
PB: predicated region body
PF: predicated region fallthrough
CT: control target
= control target key end

     0   :  { %vm102_vm0 = vcmask 523264   ;;  %vm235_vm1 = vcmask 261120   ;;  %vm4145_vm2 = vmmov 0   ;;  %s5476_s1 = inlined_call_operand.vmem [shape: bf16[64,128], index: 1, kind: input, shape index: {}]   ;;  %s5477_s0 = inlined_call_operand.vmem [shape: f32[32,64], index: 0, kind: input, shape index: {}]   ;;  %s5478_s7 = inlined_call_operand.vmem [shape: bf16[64,32], index: 7, kind: input, shape index: {}]   ;;  %s5479_s3 = inlined_call_operand.vmem [shape: bf16[2,384,128], index: 3, kind: input, shape index: {}]   ;;  %s5480_s2 = inlined_call_operand.vmem [shape: f32[1,128], index: 2, kind: input, shape index: {}]   ;;  %s5481_s8 = inlined_call_operand.vmem [shape: f32[128,128], index: 8, kind: input, shape index: {}]   ;;  %s5482_s4 = inlined_call_operand.vmem [shape: f32[2,1,128], index: 4, kind: input, shape index: {}]   ;;  %s5483_s5 = inlined_call_operand.vmem [shape: f32[2,1,128], index: 5, kind: input, shape index: {}]   ;;  %s5484_s6 = inlined_call_operand.vmem [shape: f32[2,1,128], index: 6, kind: input, shape index: {}]   ;;  %s5485_s9 = inlined_call_operand.vmem [shape: f32[32,128], index: 9, kind: output, shape index: {}]  }
   0x1   :  { %v4051_v0 = vld [vmem:[%s5476_s1 + $0x18] sm:$0xff]   ;;  %v4052_v1 = vld [vmem:[%s5476_s1 + $0x10] sm:$0xff]   ;;  %v4053_v2 = vld [vmem:[%s5476_s1 + $0x8] sm:$0xff]  }
   0x2   :  { %3425 = vmatprep.subr.bf16.mxu0 %v4051_v0  ;;  %v57_v3 = vld [vmem:[%s5477_s0] sm:$0xff]  ;;  %v58_v4 = vld [vmem:[%s5477_s0 + $0x8] sm:$0xff]  ;;  %v59_v7 = vld [vmem:[%s5477_s0 + $0x10] sm:$0xff] }
   0x3   :  { %3426 = vmatpush3.bf16.msra.mxu0 %v4051_v0  ;;  %v61_v5 = vpack.c.bf16 %v58_v4, %v57_v3  ;;  %v4054_v6 = vld [vmem:[%s5476_s1] sm:$0xff]   ;;  %v60_v8 = vld [vmem:[%s5477_s0 + $0x18] sm:$0xff]  ;;  %v4237_v12 = vld [vmem:[%s5479_s3 + $0xb0] sm:$0xff]  }
   0x4   :  { %3427 = vmatprep.subr.bf16.mxu0 %v4052_v1  ;;  %v62_v9 = vpack.c.bf16 %v60_v8, %v59_v7  ;;  %v4223_v10 = vld [vmem:[%s5478_s7] sm:$0xff]   ;;  %v4230_v11 = vld [vmem:[%s5479_s3 + $0xb8] sm:$0xff]   ;;  %v4243_v13 = vld [vmem:[%s5479_s3 + $0xa8] sm:$0xff]  }
   0x5   :  { %3433 = vmatprep.mubr.msk.bf16.mxu0 %vm102_vm0, %v61_v5  ;;  %3441 = vmatprep.mubr.msk.bf16.mxu1 %vm235_vm1, %v4223_v10  ;;  %v4250_v14 = vld [vmem:[%s5479_s3 + $0xa0] sm:$0xff]   ;;  %v4277_v30 = vld [vmem:[%s5479_s3 + $0x78] sm:$0xff]   ;;  %v4282_v31 = vld [vmem:[%s5478_s7 + $0x8] sm:$0xff]  }
   0x6   :  { %v2813_v16 = vld [vmem:[%s5480_s2] ss:$0 sm:$0xff]  ;;  %5559 = vst [vmem:[#allocation6_spill] sm:$0xff] %v4277_v30  ;;  %v4287_v32 = vld [vmem:[%s5478_s7 + $0x10] sm:$0xff]   ;;  %v4292_v33 = vld [vmem:[%s5479_s3 + $0x38] sm:$0xff]  }
   0x7   :  { %3428 = vmatpush3.bf16.msra.mxu0 %v4052_v1  ;;  %v4298_v34 = vld [vmem:[%s5479_s3 + $0x70] sm:$0xff]   ;;  %v4314_v36 = vld [vmem:[%s5479_s3 + $0x68] sm:$0xff]   ;;  %v4319_v37 = vld [vmem:[%s5478_s7 + $0x18] sm:$0xff]   ;;  %v5486_v1 = vmov 0.0  }
   0x8   :  { %3429 = vmatprep.subr.bf16.mxu0 %v4053_v2  ;;  %v4308_v35 = vld [vmem:[%s5479_s3 + $0x30] sm:$0xff]   ;;  %v4325_v38 = vld [vmem:[%s5479_s3 + $0x28] sm:$0xff]   ;;  %v4331_v39 = vld [vmem:[%s5479_s3 + $0x60] sm:$0xff]  }
   0x9   :  { %v4339_v40 = vld [vmem:[%s5479_s3 + $0x20] sm:$0xff]   ;;  %v4345_v41 = vld [vmem:[%s5479_s3 + $0x58] sm:$0xff]   ;;  %v4357_v43 = vld [vmem:[%s5479_s3 + $0x50] sm:$0xff]  }
   0xa   :  { %v4351_v42 = vld [vmem:[%s5479_s3 + $0x18] sm:$0xff]   ;;  %v4363_v44 = vld [vmem:[%s5479_s3 + $0x10] sm:$0xff]   ;;  %v4370_v45 = vld [vmem:[%s5479_s3 + $0x48] sm:$0xff]  }
   0xb   :  { %3430 = vmatpush3.bf16.msra.mxu0 %v4053_v2  ;;  %v4375_v46 = vld [vmem:[%s5479_s3 + $0x8] sm:$0xff]   ;;  %v4380_v47 = vld [vmem:[%s5479_s3 + $0x98] sm:$0xff]   ;;  %v4389_v48 = vld [vmem:[%s5479_s3 + $0x40] sm:$0xff]  }
   0xc   :  { %3431 = vmatprep.subr.bf16.mxu0 %v4054_v6  ;;  %v4394_v49 = vld [vmem:[%s5479_s3] sm:$0xff]   ;;  %v4399_v50 = vld [vmem:[%s5479_s3 + $0x90] sm:$0xff]   ;;  %v4408_v51 = vld [vmem:[%s5479_s3 + $0x88] sm:$0xff]  }
   0xd   :  { %v4415_v52 = vld [vmem:[%s5479_s3 + $0x80] sm:$0xff]   ;;  %v4424_v2 = vld [vmem:[%s5481_s8 + $0x78] sm:$0xff]  ;;  %v4433_v3 = vld [vmem:[%s5481_s8 + $0x70] sm:$0xff] }
   0xe   :  { %v4442_v4 = vld [vmem:[%s5481_s8 + $0x68] sm:$0xff]  ;;  %v4451_v5 = vld [vmem:[%s5481_s8 + $0x60] sm:$0xff]  ;;  %v4469_v7 = vld [vmem:[%s5481_s8 + $0x50] sm:$0xff] }
   0xf   :  { %3432 = vmatpush3.bf16.msra.mxu0 %v4054_v6  ;;  %v4460_v6 = vld [vmem:[%s5481_s8 + $0x58] sm:$0xff]  ;;  %v4478_v8 = vld [vmem:[%s5481_s8 + $0x48] sm:$0xff] }
  0x10   :  { %3449 = vmatprep.subr.bf16.mxu0 %v4230_v11 }
  0x12   :  { %3434 = vmatmul.mubr.msk.bf16.vlgmr.msra.gmra.mxu0 %vm102_vm0, %v62_v9  ;;  %v4487_v9 = vld [vmem:[%s5481_s8 + $0x40] sm:$0xff] }
  0x13   :  { %3450 = vmatpush3.bf16.msra.mxu0 %v4230_v11  ;;  %5560 = vst [vmem:[#allocation7_spill] sm:$0xff] %v4487_v9 }
  0x14   :  { %3451 = vmatprep.subr.bf16.mxu0 %v4237_v12 }
  0x17   :  { %3452 = vmatpush3.bf16.msra.mxu0 %v4237_v12 }
  0x18   :  { %3453 = vmatprep.subr.bf16.mxu0 %v4243_v13 }
  0x1b   :  { %3454 = vmatpush3.bf16.msra.mxu0 %v4243_v13 }
  0x1c   :  { %3455 = vmatprep.subr.bf16.mxu0 %v4250_v14 }
  0x1f   :  { %3456 = vmatpush3.bf16.msra.mxu0 %v4250_v14 }
  0x20   :  { %3457 = vmatprep.subr.bf16.mxu0 %v4380_v47 }
  0x23   :  { %3458 = vmatpush3.bf16.msra.mxu0 %v4380_v47 }
  0x24   :  { %3459 = vmatprep.subr.bf16.mxu0 %v4399_v50 }
  0x27   :  { %3460 = vmatpush3.bf16.msra.mxu0 %v4399_v50 }
  0x28   :  { %3461 = vmatprep.subr.bf16.mxu0 %v4408_v51 }
  0x2b   :  { %3462 = vmatpush3.bf16.msra.mxu0 %v4408_v51 }
  0x2c   :  { %3463 = vmatprep.subr.bf16.mxu0 %v4415_v52 }
  0x2f   :  { %3464 = vmatpush3.bf16.msra.mxu0 %v4415_v52 }
  0x30   :  { %3504 = vmatprep.subr.mxu0 %v5486_v1 }
  0xd2   :  { %v3435_v15 = vpop.f32.mrf.mxu0 }
  0xd3   :  { %v152_v18 = vadd.f32 %v3435_v15, %v2813_v16  ;;  %v4496_v15 = vld [vmem:[%s5481_s8 + $0x38] sm:$0xff] }
  0xd4   :  { %v143_v17 = vpop.f32.mrf.mxu0  ;;  %5561 = vst [vmem:[#allocation8_spill] sm:$0xff] %v4496_v15 }
  0xd5   :  { %v144_v20 = vadd.f32 %v2813_v16, %v143_v17  ;;  %v4258_v23 = vmax.f32 %v152_v18, 0.0  ;;  %v4514_v17 = vld [vmem:[%s5481_s8 + $0x28] sm:$0xff]  ;;  %v4523_v18 = vld [vmem:[%s5481_s8 + $0x20] sm:$0xff] }
  0xd6   :  { %v3436_v19 = vpop.f32.mrf.mxu0  ;;  %5563 = vst [vmem:[#allocation10_spill] sm:$0xff] %v4514_v17  ;;  %5564 = vst [vmem:[#allocation11_spill] sm:$0xff] %v4523_v18 }
  0xd7   :  { %v155_v21 = vadd.f32 %v3436_v19, %v2813_v16  ;;  %5555 = vst [vmem:[#allocation2_spill] sm:$0xff] %v4258_v23  ;;  %v4262_v26 = vmax.f32 %v144_v20, 0.0  ;;  %v4532_v19 = vld [vmem:[%s5481_s8 + $0x18] sm:$0xff]  ;;  %v4541_v20 = vld [vmem:[%s5481_s8 + $0x10] sm:$0xff] }
  0xd8   :  { %v146_v22 = vpop.f32.mrf.mxu0  ;;  %5565 = vst [vmem:[#allocation12_spill] sm:$0xff] %v4532_v19  ;;  %5566 = vst [vmem:[#allocation13_spill] sm:$0xff] %v4541_v20 }
  0xd9   :  { %v4260_v24 = vmax.f32 %v155_v21, 0.0  ;;  %v147_v25 = vadd.f32 %v2813_v16, %v146_v22  ;;  %5557 = vst [vmem:[#allocation4_spill] sm:$0xff] %v4262_v26  ;;  %v4505_v16 = vld [vmem:[%s5481_s8 + $0x30] sm:$0xff]  ;;  %v4550_v21 = vld [vmem:[%s5481_s8 + $0x8] sm:$0xff]  ;;  %v4555_v22 = vld [vmem:[%s5481_s8] sm:$0xff] }
  0xda   :  { %5562 = vst [vmem:[#allocation9_spill] sm:$0xff] %v4505_v16  ;;  %5567 = vst [vmem:[#allocation14_spill] sm:$0xff] %v4550_v21 }
  0xdb   :  { %5556 = vst [vmem:[#allocation3_spill] sm:$0xff] %v4260_v24  ;;  %v4264_v27 = vmax.f32 %v147_v25, 0.0  ;;  %v4268_v28 = vpack.c.bf16 %v4260_v24, %v4258_v23  ;;  %5568 = vst [vmem:[#allocation15_spill] sm:$0xff] %v4555_v22 }
  0xdd   :  { %5558 = vst [vmem:[#allocation5_spill] sm:$0xff] %v4264_v27  ;;  %3437 = vmatprep.subr.bf16.mxu1 %v4268_v28  ;;  %v213_v29 = vpack.c.bf16 %v4264_v27, %v4262_v26 }
  0xde   :  { %3438 = vmatpush3.bf16.msra.mxu1 %v4268_v28 }
  0xdf   :  { %3439 = vmatprep.subr.bf16.mxu1 %v213_v29 }
  0xe2   :  { %3440 = vmatpush3.bf16.msra.mxu1 %v213_v29 }
  0xe3   :  { %2963 = vmatprep.subr.bf16.mxu1 %v4277_v30 }
  0xe5   :  { %3442 = vmatmul.mubr.msk.bf16.vlgmr.msra.gmra.mxu1 %vm235_vm1, %v4282_v31 }
  0xe6   :  { %3445 = vmatprep.mubr.msk.bf16.mxu1 %vm235_vm1, %v4287_v32  ;;  %2964 = vmatpush3.bf16.msra.mxu1 %v4292_v33 }
  0xe7   :  { %2965 = vmatprep.subr.bf16.mxu1 %v4298_v34 }
  0xea   :  { %2966 = vmatpush3.bf16.msra.mxu1 %v4308_v35 }
  0xeb   :  { %2967 = vmatprep.subr.bf16.mxu1 %v4314_v36 }
  0xed   :  { %3446 = vmatmul.mubr.msk.bf16.gmra.mxu1 %vm235_vm1, %v4319_v37 }
  0xee   :  { %499 = vmatprep.mubr.bf16.mxu1 %v213_v29  ;;  %2968 = vmatpush3.bf16.msra.mxu1 %v4325_v38 }
  0xef   :  { %2969 = vmatprep.subr.bf16.mxu1 %v4331_v39 }
  0xf2   :  { %2970 = vmatpush3.bf16.msra.mxu1 %v4339_v40 }
  0xf3   :  { %2971 = vmatprep.subr.bf16.mxu1 %v4345_v41 }
  0xf6   :  { %2972 = vmatpush3.bf16.msra.mxu1 %v4351_v42 }
  0xf7   :  { %2973 = vmatprep.subr.bf16.mxu1 %v4357_v43 }
  0xfa   :  { %2974 = vmatpush3.bf16.msra.mxu1 %v4363_v44 }
  0xfb   :  { %2975 = vmatprep.subr.bf16.mxu1 %v4370_v45 }
  0xfe   :  { %2976 = vmatpush3.bf16.msra.mxu1 %v4375_v46 }
  0xff   :  { %2977 = vmatprep.subr.bf16.mxu1 %v4389_v48 }
 0x102   :  { %2978 = vmatpush3.bf16.msra.mxu1 %v4394_v49 }
 0x103   :  { %3469 = vmatprep.subr.mxu1 %v5486_v1 }
 0x1a5   :  { %v3443_v53 = vpop.f32.mrf.mxu1 }
 0x1a7   :  { %v282_v54 = vpop.f32.mrf.mxu1 }
 0x1a9   :  { %v3444_v55 = vpop.f32.mrf.mxu1 }
 0x1aa   :  { %v314_v62 = vpack.c.bf16 %v3444_v55, %v3443_v53 }
 0x1ab   :  { %v285_v56 = vpop.f32.mrf.mxu1 }
 0x1ac   :  { %v313_v57 = vpack.c.bf16 %v285_v56, %v282_v54 }
 0x1ad   :  { %v3447_v58 = vpop.f32.mrf.mxu1 }
 0x1ae   :  { %500 = vmatmul.mubr.bf16.vlgmr.msra.gmra.mxu1 %v313_v57 }
 0x1af   :  { %v298_v59 = vpop.f32.mrf.mxu1  ;;  %507 = vmatprep.mubr.bf16.mxu1 %v4268_v28  ;;  %3470 = vmatpush3.msra.mxu1 %v4424_v2 }
 0x1b0   :  { %3471 = vmatprep.subr.mxu1 %v5486_v1 }
 0x1b1   :  { %v3448_v60 = vpop.f32.mrf.mxu1  ;;  %3472 = vmatpush3.msra.mxu1 %v4433_v3 }
 0x1b2   :  { %v316_v0 = vpack.c.bf16 %v3448_v60, %v3447_v58  ;;  %3473 = vmatprep.subr.mxu1 %v5486_v1 }
 0x1b3   :  { %v301_v61 = vpop.f32.mrf.mxu1  ;;  %3474 = vmatpush3.msra.mxu1 %v4442_v4 }
 0x1b4   :  { %v315_v63 = vpack.c.bf16 %v301_v61, %v298_v59  ;;  %3475 = vmatprep.subr.mxu1 %v5486_v1  ;;  %v4572_v59 = vld [vmem:[%s5482_s4] ss:$0 sm:$0xff] }
 0x1b5   :  { %3476 = vmatpush3.msra.mxu1 %v4451_v5 }
 0x1b6   :  { %508 = vmatmul.mubr.bf16.gmra.mxu1 %v314_v62  ;;  %3465 = vmatprep.mubr.bf16.mxu0 %v315_v63 }
 0x1b7   :  { %3466 = vmatmul.mubr.bf16.vlgmr.msra.gmra.mxu0 %v316_v0  ;;  %3477 = vmatprep.subr.mxu1 %v5486_v1 }
 0x1b8   :  { %3505 = vmatpush3.msra.mxu0 %v4424_v2  ;;  %3478 = vmatpush3.msra.mxu1 %v4460_v6 }
 0x1b9   :  { %3506 = vmatprep.subr.mxu0 %v5486_v1  ;;  %3479 = vmatprep.subr.mxu1 %v5486_v1 }
 0x1ba   :  { %3507 = vmatpush3.msra.mxu0 %v4433_v3  ;;  %3480 = vmatpush3.msra.mxu1 %v4469_v7 }
 0x1bb   :  { %3508 = vmatprep.subr.mxu0 %v5486_v1  ;;  %3481 = vmatprep.subr.mxu1 %v5486_v1 }
 0x1bc   :  { %3509 = vmatpush3.msra.mxu0 %v4442_v4  ;;  %3482 = vmatpush3.msra.mxu1 %v4478_v8 }
 0x1bd   :  { %3510 = vmatprep.subr.mxu0 %v5486_v1  ;;  %3483 = vmatprep.subr.mxu1 %v5486_v1 }
 0x1be   :  { %3511 = vmatpush3.msra.mxu0 %v4451_v5  ;;  %3484 = vmatpush3.msra.mxu1 %v4487_v9 }
 0x1bf   :  { %3512 = vmatprep.subr.mxu0 %v5486_v1  ;;  %3485 = vmatprep.subr.mxu1 %v5486_v1 }
 0x1c0   :  { %3513 = vmatpush3.msra.mxu0 %v4460_v6  ;;  %3486 = vmatpush3.msra.mxu1 %v4496_v15 }
 0x1c1   :  { %3514 = vmatprep.subr.mxu0 %v5486_v1  ;;  %3487 = vmatprep.subr.mxu1 %v5486_v1 }
 0x1c2   :  { %3515 = vmatpush3.msra.mxu0 %v4469_v7  ;;  %3488 = vmatpush3.msra.mxu1 %v4505_v16 }
 0x1c3   :  { %3516 = vmatprep.subr.mxu0 %v5486_v1  ;;  %3489 = vmatprep.subr.mxu1 %v5486_v1 }
 0x1c4   :  { %3517 = vmatpush3.msra.mxu0 %v4478_v8  ;;  %3490 = vmatpush3.msra.mxu1 %v4514_v17 }
 0x1c5   :  { %3518 = vmatprep.subr.mxu0 %v5486_v1  ;;  %3491 = vmatprep.subr.mxu1 %v5486_v1 }
 0x1c6   :  { %3519 = vmatpush3.msra.mxu0 %v4487_v9  ;;  %3492 = vmatpush3.msra.mxu1 %v4523_v18 }
 0x1c7   :  { %3520 = vmatprep.subr.mxu0 %v5486_v1  ;;  %3493 = vmatprep.subr.mxu1 %v5486_v1 }
 0x1c8   :  { %3521 = vmatpush3.msra.mxu0 %v4496_v15  ;;  %3494 = vmatpush3.msra.mxu1 %v4532_v19 }
 0x1c9   :  { %3522 = vmatprep.subr.mxu0 %v5486_v1  ;;  %3495 = vmatprep.subr.mxu1 %v5486_v1 }
 0x1ca   :  { %3523 = vmatpush3.msra.mxu0 %v4505_v16  ;;  %3496 = vmatpush3.msra.mxu1 %v4541_v20 }
 0x1cb   :  { %3524 = vmatprep.subr.mxu0 %v5486_v1  ;;  %3497 = vmatprep.subr.mxu1 %v5486_v1 }
 0x1cc   :  { %3525 = vmatpush3.msra.mxu0 %v4514_v17  ;;  %3498 = vmatpush3.msra.mxu1 %v4550_v21 }
 0x1cd   :  { %3526 = vmatprep.subr.mxu0 %v5486_v1  ;;  %3501 = vmatprep.mubr.msk.f32.mxu1 %vm4145_vm2, %v5486_v1 }
 0x1ce   :  { %3527 = vmatpush3.msra.mxu0 %v4523_v18  ;;  %3499 = vmatprep.subr.mxu1 %v5486_v1 }
 0x1cf   :  { %3528 = vmatprep.subr.mxu0 %v5486_v1  ;;  %3500 = vmatpush3.msra.mxu1 %v4555_v22 }
 0x1d0   :  { %3529 = vmatpush3.msra.mxu0 %v4532_v19  ;;  %3536 = vmatprep.mubr.msk.f32.mxu0 %vm4145_vm2, %v5486_v1 }
 0x1d1   :  { %3530 = vmatprep.subr.mxu0 %v5486_v1 }
 0x1d2   :  { %3531 = vmatpush3.msra.mxu0 %v4541_v20 }
 0x1d3   :  { %3532 = vmatprep.subr.mxu0 %v5486_v1 }
 0x1d4   :  { %3533 = vmatpush3.msra.mxu0 %v4550_v21 }
 0x1d5   :  { %3534 = vmatprep.subr.mxu0 %v5486_v1 }
 0x1d6   :  { %3535 = vmatpush3.msra.mxu0 %v4555_v22 }
 0x1d7   :  { %3041 = vmatprep.subr.bf16.mxu0 %v4277_v30 }
 0x26e   :  { %v2979_v25 = vpop.f32.mrf.mxu1 }
 0x270   :  { %v2980_v28 = vpop.f32.mrf.mxu1 }
 0x271   :  { %v2981_v56 = vadd.f32 %v2980_v28, %v2979_v25 }
 0x272   :  { %v2982_v29 = vpop.f32.mrf.mxu1 }
 0x273   :  { %v502_v1 = vadd.f32 %v2981_v56, %v4572_v59 }
 0x274   :  { %v2983_v53 = vpop.f32.mrf.mxu1 }
 0x275   :  { %v2984_v57 = vadd.f32 %v2983_v53, %v2982_v29 }
 0x276   :  { %v2985_v54 = vpop.f32.mrf.mxu1 }
 0x277   :  { %v3467_v55 = vpop.f32.mrf.mxu0  ;;  %v505_v22 = vadd.f32 %v2984_v57, %v4572_v59 }
 0x278   :  { %v2986_v58 = vpop.f32.mrf.mxu1 }
 0x279   :  { %v2987_v60 = vadd.f32 %v2986_v58, %v2985_v54  ;;  %v550_v61 = vpop.f32.mrf.mxu0 }
 0x27a   :  { %v2988_v62 = vpop.f32.mrf.mxu1  ;;  %v551_v28 = vadd.f32 %v550_v61, %v502_v1 }
 0x27b   :  { %v3468_v63 = vpop.f32.mrf.mxu0  ;;  %v510_v0 = vadd.f32 %v2987_v60, %v4572_v59 }
 0x27c   :  { %v2989_v30 = vpop.f32.mrf.mxu1 }
 0x27d   :  { %v2990_v21 = vadd.f32 %v2989_v30, %v2988_v62  ;;  %v553_v25 = vpop.f32.mrf.mxu0  ;;  %v559_v20 = vadd.f32 %v3467_v55, %v510_v0  ;;  %v645_v30 = vlaneseq }
 0x27e   :  { %v554_v29 = vadd.f32 %v553_v25, %v505_v22 }
 0x27f   :  { %v513_v53 = vadd.f32 %v2990_v21, %v4572_v59  ;;  %v646_v1 = vshrl.u32 %v645_v30, 7 }
 0x280   :  { %v565_v19 = vadd.f32 %v554_v29, %v551_v28 }
 0x281   :  { %v562_v18 = vadd.f32 %v3468_v63, %v513_v53  ;;  %v4580_v22 = vsub.s32 0, %v646_v1 }
 0x282   :  { %v566_v54 = vadd.f32 %v565_v19, %v559_v20 }
 0x284   :  { %v567_v58 = vadd.f32 %v566_v54, %v562_v18 }
 0x286   :  { %v568_v17 = vrot.slane %v567_v58, 4 }
 0x288   :  { %v569_v16 = vadd.f32 %v568_v17, %v567_v58 }
 0x28a   :  { %v570_v15 = vrot.slane %v569_v16, 2 }
 0x28c   :  { %v571_v60 = vadd.f32 %v570_v15, %v569_v16 }
 0x28e   :  { %v572_v9 = vrot.slane %v571_v60, 1 }
 0x290   :  { %v573_v56 = vadd.f32 %v572_v9, %v571_v60 }
 0x292   :  { %3502 = vmatmul.mubr.f32.vlgmr.msra.gmra.mxu1 %v573_v56 }
 0x293   :  { %3543 = vmatprep.mubr.msk.bf16.mxu1 %vm235_vm1, %v4223_v10 }
 0x352   :  { %v640_v21 = vpop.f32.mrf.mxu1 }
 0x353   :  { %v644_v55 = vmul.f32 0.001953125, %v640_v21 }
 0x354   :  { %v3503_v57 = vpop.f32.mrf.mxu1 }
 0x355   :  { %v648_v19 = vrot.slane %v644_v55, %v4580_v22  ;;  %v4602_v55 = vld [vmem:[%s5483_s5] sm:$0x1] }
 0x357   :  { %v649_v61 = vsub.f32 %v551_v28, %v648_v19  ;;  %v650_v62 = vsub.f32 %v554_v29, %v648_v19  ;;  %v651_v17 = vsub.f32 %v559_v20, %v648_v19  ;;  %v652_v63 = vsub.f32 %v562_v18, %v648_v19 }
 0x358   :  { %v5569_v18 = vmov 0.0  }
 0x359   :  { %v653_v15 = vmul.f32 %v649_v61, %v649_v61  ;;  %v654_v16 = vmul.f32 %v650_v62, %v650_v62  ;;  %v655_v9 = vmul.f32 %v651_v17, %v651_v17  ;;  %v656_v25 = vmul.f32 %v652_v63, %v652_v63 }
 0x35b   :  { %v657_v0 = vadd.f32 %v654_v16, %v653_v15  ;;  %v4609_v16 = vld [vmem:[%s5484_s6] ss:$0 sm:$0xff] }
 0x35d   :  { %v658_v53 = vadd.f32 %v657_v0, %v655_v9 }
 0x35f   :  { %v659_v10 = vadd.f32 %v658_v53, %v656_v25 }
 0x361   :  { %v660_v54 = vrot.slane %v659_v10, 4 }
 0x363   :  { %v661_v58 = vadd.f32 %v660_v54, %v659_v10 }
 0x365   :  { %v662_v60 = vrot.slane %v661_v58, 2 }
 0x367   :  { %v663_v56 = vadd.f32 %v662_v60, %v661_v58 }
 0x369   :  { %v664_v30 = vrot.slane %v663_v56, 1 }
 0x36b   :  { %v665_v1 = vadd.f32 %v664_v30, %v663_v56 }
 0x36d   :  { %3537 = vmatmul.mubr.f32.vlgmr.msra.gmra.mxu0 %v665_v1 }
 0x36e   :  { %3042 = vmatpush3.bf16.msra.mxu0 %v4292_v33 }
 0x36f   :  { %3043 = vmatprep.subr.bf16.mxu0 %v4298_v34 }
 0x372   :  { %3044 = vmatpush3.bf16.msra.mxu0 %v4308_v35 }
 0x373   :  { %3045 = vmatprep.subr.bf16.mxu0 %v4314_v36 }
 0x376   :  { %3046 = vmatpush3.bf16.msra.mxu0 %v4325_v38 }
 0x377   :  { %3047 = vmatprep.subr.bf16.mxu0 %v4331_v39 }
 0x37a   :  { %3048 = vmatpush3.bf16.msra.mxu0 %v4339_v40 }
 0x37b   :  { %3049 = vmatprep.subr.bf16.mxu0 %v4345_v41 }
 0x37e   :  { %3050 = vmatpush3.bf16.msra.mxu0 %v4351_v42 }
 0x37f   :  { %3051 = vmatprep.subr.bf16.mxu0 %v4357_v43 }
 0x382   :  { %3052 = vmatpush3.bf16.msra.mxu0 %v4363_v44 }
 0x383   :  { %3053 = vmatprep.subr.bf16.mxu0 %v4370_v45 }
 0x386   :  { %3054 = vmatpush3.bf16.msra.mxu0 %v4375_v46 }
 0x387   :  { %3055 = vmatprep.subr.bf16.mxu0 %v4389_v48 }
 0x38a   :  { %3056 = vmatpush3.bf16.msra.mxu0 %v4394_v49 }
 0x38b   :  { %3571 = vmatprep.subr.mxu0 %v5569_v18 }
 0x42d   :  { %v732_v20 = vpop.f32.mrf.mxu0 }
 0x42e   :  { %v736_v28 = vmul.f32 0.001953125, %v732_v20 }
 0x42f   :  { %v3538_v29 = vpop.f32.mrf.mxu0 }
 0x430   :  { %v737_v21 = vadd.f32 1e-05, %v736_v28 }
 0x432   :  { %4107 = vrsqrt.f32 %v737_v21 }
 0x43f   :  { %v4108_v57 = vpop.eup %4107 }
 0x440   :  { %v739_v19 = vmul.f32 %v4108_v57, %v4602_v55 }
 0x442   :  { %v744_v15 = vrot.slane %v739_v19, %v4580_v22 }
 0x444   :  { %v748_v9 = vmul.f32 %v744_v15, %v651_v17  ;;  %v749_v0 = vmul.f32 %v744_v15, %v652_v63  ;;  %v746_v25 = vmul.f32 %v744_v15, %v649_v61  ;;  %v747_v53 = vmul.f32 %v744_v15, %v650_v62 }
 0x446   :  { %v758_v10 = vadd.f32 %v4609_v16, %v748_v9  ;;  %v759_v54 = vadd.f32 %v4609_v16, %v749_v0  ;;  %v756_v58 = vadd.f32 %v4609_v16, %v746_v25  ;;  %v757_v60 = vadd.f32 %v4609_v16, %v747_v53 }
 0x448   :  { %v762_v56 = vmax.f32 %v758_v10, 0.0  ;;  %v763_v30 = vmax.f32 %v759_v54, 0.0  ;;  %v760_v1 = vmax.f32 %v756_v58, 0.0  ;;  %v761_v20 = vmax.f32 %v757_v60, 0.0  ;;  %v5570_v10 = vld [vmem:[#allocation7_spill] sm:$0xff]  ;;  %v5571_v54 = vld [vmem:[#allocation8_spill] sm:$0xff] }
 0x449   :  { %v5572_v58 = vld [vmem:[#allocation9_spill] sm:$0xff]  ;;  %v5573_v60 = vld [vmem:[#allocation10_spill] sm:$0xff] }
 0x44a   :  { %v766_v28 = vadd.f32 %v762_v56, %v4258_v23  ;;  %v767_v29 = vadd.f32 %v763_v30, %v4260_v24  ;;  %v764_v17 = vadd.f32 %v760_v1, %v4262_v26  ;;  %v765_v61 = vadd.f32 %v761_v20, %v4264_v27  ;;  %v5574_v56 = vld [vmem:[#allocation11_spill] sm:$0xff]  ;;  %v5575_v30 = vld [vmem:[#allocation12_spill] sm:$0xff]  ;;  %v5576_v1 = vld [vmem:[#allocation13_spill] sm:$0xff] }
 0x44b   :  { %v5577_v20 = vld [vmem:[#allocation14_spill] sm:$0xff] }
 0x44c   :  { %v769_v62 = vpack.c.bf16 %v767_v29, %v766_v28  ;;  %v768_v63 = vpack.c.bf16 %v765_v61, %v764_v17  ;;  %v5578_v28 = vld [vmem:[#allocation15_spill] sm:$0xff]  ;;  %v5579_v29 = vld [vmem:[#allocation6_spill] sm:$0xff] }
 0x44e   :  { %3539 = vmatprep.subr.bf16.mxu1 %v769_v62  ;;  %871 = vmatprep.mubr.bf16.mxu0 %v768_v63 }
 0x44f   :  { %3540 = vmatpush3.bf16.msra.mxu1 %v769_v62 }
 0x450   :  { %3541 = vmatprep.subr.bf16.mxu1 %v768_v63 }
 0x453   :  { %3542 = vmatpush3.bf16.msra.mxu1 %v768_v63 }
 0x454   :  { %3551 = vmatprep.subr.bf16.mxu1 %v4230_v11 }
 0x456   :  { %3544 = vmatmul.mubr.msk.bf16.vlgmr.msra.gmra.mxu1 %vm235_vm1, %v4282_v31 }
 0x457   :  { %3547 = vmatprep.mubr.msk.bf16.mxu1 %vm235_vm1, %v4287_v32  ;;  %3552 = vmatpush3.bf16.msra.mxu1 %v4230_v11 }
 0x458   :  { %3553 = vmatprep.subr.bf16.mxu1 %v4237_v12 }
 0x45b   :  { %3554 = vmatpush3.bf16.msra.mxu1 %v4237_v12 }
 0x45c   :  { %3555 = vmatprep.subr.bf16.mxu1 %v4243_v13 }
 0x45e   :  { %3548 = vmatmul.mubr.msk.bf16.gmra.mxu1 %vm235_vm1, %v4319_v37 }
 0x45f   :  { %3556 = vmatpush3.bf16.msra.mxu1 %v4243_v13 }
 0x460   :  { %3557 = vmatprep.subr.bf16.mxu1 %v4250_v14 }
 0x463   :  { %3558 = vmatpush3.bf16.msra.mxu1 %v4250_v14 }
 0x464   :  { %3559 = vmatprep.subr.bf16.mxu1 %v4380_v47 }
 0x467   :  { %3560 = vmatpush3.bf16.msra.mxu1 %v4380_v47 }
 0x468   :  { %3561 = vmatprep.subr.bf16.mxu1 %v4399_v50 }
 0x46b   :  { %3562 = vmatpush3.bf16.msra.mxu1 %v4399_v50 }
 0x46c   :  { %3563 = vmatprep.subr.bf16.mxu1 %v4408_v51 }
 0x46f   :  { %3564 = vmatpush3.bf16.msra.mxu1 %v4408_v51 }
 0x470   :  { %3565 = vmatprep.subr.bf16.mxu1 %v4415_v52 }
 0x473   :  { %3566 = vmatpush3.bf16.msra.mxu1 %v4415_v52 }
 0x474   :  { %3606 = vmatprep.subr.mxu1 %v5569_v18 }
 0x516   :  { %v3545_v11 = vpop.f32.mrf.mxu1 }
 0x518   :  { %v804_v12 = vpop.f32.mrf.mxu1 }
 0x51a   :  { %v3546_v13 = vpop.f32.mrf.mxu1 }
 0x51b   :  { %v836_v0 = vpack.c.bf16 %v3546_v13, %v3545_v11 }
 0x51c   :  { %v807_v14 = vpop.f32.mrf.mxu1 }
 0x51d   :  { %v835_v21 = vpack.c.bf16 %v807_v14, %v804_v12 }
 0x51e   :  { %v3549_v57 = vpop.f32.mrf.mxu1 }
 0x51f   :  { %872 = vmatmul.mubr.bf16.vlgmr.msra.gmra.mxu0 %v835_v21 }
 0x520   :  { %v820_v19 = vpop.f32.mrf.mxu1  ;;  %879 = vmatprep.mubr.bf16.mxu0 %v769_v62  ;;  %3572 = vmatpush3.msra.mxu0 %v4424_v2 }
 0x521   :  { %3573 = vmatprep.subr.mxu0 %v5569_v18 }
 0x522   :  { %v3550_v15 = vpop.f32.mrf.mxu1  ;;  %3574 = vmatpush3.msra.mxu0 %v4433_v3 }
 0x523   :  { %3575 = vmatprep.subr.mxu0 %v5569_v18  ;;  %v838_v53 = vpack.c.bf16 %v3550_v15, %v3549_v57 }
 0x524   :  { %v823_v9 = vpop.f32.mrf.mxu1  ;;  %3576 = vmatpush3.msra.mxu0 %v4442_v4 }
 0x525   :  { %v837_v25 = vpack.c.bf16 %v823_v9, %v820_v19  ;;  %3577 = vmatprep.subr.mxu0 %v5569_v18 }
 0x526   :  { %3578 = vmatpush3.msra.mxu0 %v4451_v5 }
 0x527   :  { %880 = vmatmul.mubr.bf16.gmra.mxu0 %v836_v0  ;;  %3567 = vmatprep.mubr.bf16.mxu1 %v837_v25 }
 0x528   :  { %3568 = vmatmul.mubr.bf16.vlgmr.msra.gmra.mxu1 %v838_v53  ;;  %3579 = vmatprep.subr.mxu0 %v5569_v18 }
 0x529   :  { %3580 = vmatpush3.msra.mxu0 %v4460_v6  ;;  %3603 = vmatprep.mubr.msk.f32.mxu0 %vm4145_vm2, %v5569_v18 }
 0x52a   :  { %3581 = vmatprep.subr.mxu0 %v5569_v18  ;;  %3607 = vmatpush3.msra.mxu1 %v4424_v2 }
 0x52b   :  { %3582 = vmatpush3.msra.mxu0 %v4469_v7  ;;  %3608 = vmatprep.subr.mxu1 %v5569_v18 }
 0x52c   :  { %3583 = vmatprep.subr.mxu0 %v5569_v18  ;;  %3609 = vmatpush3.msra.mxu1 %v4433_v3 }
 0x52d   :  { %3584 = vmatpush3.msra.mxu0 %v4478_v8  ;;  %3610 = vmatprep.subr.mxu1 %v5569_v18 }
 0x52e   :  { %3585 = vmatprep.subr.mxu0 %v5569_v18  ;;  %3611 = vmatpush3.msra.mxu1 %v4442_v4 }
 0x52f   :  { %3586 = vmatpush3.msra.mxu0 %v5570_v10  ;;  %3612 = vmatprep.subr.mxu1 %v5569_v18 }
 0x530   :  { %3587 = vmatprep.subr.mxu0 %v5569_v18  ;;  %3613 = vmatpush3.msra.mxu1 %v4451_v5 }
 0x531   :  { %3588 = vmatpush3.msra.mxu0 %v5571_v54  ;;  %3614 = vmatprep.subr.mxu1 %v5569_v18 }
 0x532   :  { %3589 = vmatprep.subr.mxu0 %v5569_v18  ;;  %3615 = vmatpush3.msra.mxu1 %v4460_v6 }
 0x533   :  { %3590 = vmatpush3.msra.mxu0 %v5572_v58  ;;  %3616 = vmatprep.subr.mxu1 %v5569_v18 }
 0x534   :  { %3591 = vmatprep.subr.mxu0 %v5569_v18  ;;  %3617 = vmatpush3.msra.mxu1 %v4469_v7 }
 0x535   :  { %3592 = vmatpush3.msra.mxu0 %v5573_v60  ;;  %3618 = vmatprep.subr.mxu1 %v5569_v18 }
 0x536   :  { %3593 = vmatprep.subr.mxu0 %v5569_v18  ;;  %3619 = vmatpush3.msra.mxu1 %v4478_v8 }
 0x537   :  { %3594 = vmatpush3.msra.mxu0 %v5574_v56  ;;  %3620 = vmatprep.subr.mxu1 %v5569_v18 }
 0x538   :  { %3595 = vmatprep.subr.mxu0 %v5569_v18  ;;  %3621 = vmatpush3.msra.mxu1 %v5570_v10 }
 0x539   :  { %3596 = vmatpush3.msra.mxu0 %v5575_v30  ;;  %3622 = vmatprep.subr.mxu1 %v5569_v18 }
 0x53a   :  { %3597 = vmatprep.subr.mxu0 %v5569_v18  ;;  %3623 = vmatpush3.msra.mxu1 %v5571_v54 }
 0x53b   :  { %3598 = vmatpush3.msra.mxu0 %v5576_v1  ;;  %3624 = vmatprep.subr.mxu1 %v5569_v18 }
 0x53c   :  { %3599 = vmatprep.subr.mxu0 %v5569_v18  ;;  %3625 = vmatpush3.msra.mxu1 %v5572_v58 }
 0x53d   :  { %3600 = vmatpush3.msra.mxu0 %v5577_v20  ;;  %3626 = vmatprep.subr.mxu1 %v5569_v18 }
 0x53e   :  { %3601 = vmatprep.subr.mxu0 %v5569_v18  ;;  %3627 = vmatpush3.msra.mxu1 %v5573_v60 }
 0x53f   :  { %3602 = vmatpush3.msra.mxu0 %v5578_v28  ;;  %3628 = vmatprep.subr.mxu1 %v5569_v18 }
 0x540   :  { %3629 = vmatpush3.msra.mxu1 %v5574_v56  ;;  %3638 = vmatprep.mubr.msk.f32.mxu1 %vm4145_vm2, %v5569_v18 }
 0x541   :  { %3630 = vmatprep.subr.mxu1 %v5569_v18 }
 0x542   :  { %3631 = vmatpush3.msra.mxu1 %v5575_v30 }
 0x543   :  { %3632 = vmatprep.subr.mxu1 %v5569_v18 }
 0x544   :  { %3633 = vmatpush3.msra.mxu1 %v5576_v1 }
 0x545   :  { %3634 = vmatprep.subr.mxu1 %v5569_v18 }
 0x546   :  { %3635 = vmatpush3.msra.mxu1 %v5577_v20 }
 0x547   :  { %3636 = vmatprep.subr.mxu1 %v5569_v18 }
 0x548   :  { %3637 = vmatpush3.msra.mxu1 %v5578_v28 }
 0x549   :  { %3119 = vmatprep.subr.bf16.mxu1 %v5579_v29 }
 0x5df   :  { %v3057_v17 = vpop.f32.mrf.mxu0 }
 0x5e1   :  { %v3058_v61 = vpop.f32.mrf.mxu0 }
 0x5e2   :  { %v3059_v13 = vadd.f32 %v3058_v61, %v3057_v17 }
 0x5e3   :  { %v3060_v62 = vpop.f32.mrf.mxu0 }
 0x5e4   :  { %v874_v25 = vadd.f32 %v3059_v13, %v4572_v59 }
 0x5e5   :  { %v3061_v63 = vpop.f32.mrf.mxu0 }
 0x5e6   :  { %v3062_v14 = vadd.f32 %v3061_v63, %v3060_v62 }
 0x5e7   :  { %v3063_v11 = vpop.f32.mrf.mxu0 }
 0x5e8   :  { %v3569_v12 = vpop.f32.mrf.mxu1  ;;  %v877_v29 = vadd.f32 %v3062_v14, %v4572_v59  ;;  %v4716_v14 = vld [vmem:[%s5478_s7] sm:$0xff]  }
 0x5e9   :  { %v3064_v21 = vpop.f32.mrf.mxu0 }
 0x5ea   :  { %v3065_v57 = vadd.f32 %v3064_v21, %v3063_v11  ;;  %v922_v19 = vpop.f32.mrf.mxu1 }
 0x5eb   :  { %v3066_v15 = vpop.f32.mrf.mxu0  ;;  %v923_v1 = vadd.f32 %v922_v19, %v874_v25 }
 0x5ec   :  { %v3570_v9 = vpop.f32.mrf.mxu1  ;;  %v882_v0 = vadd.f32 %v3065_v57, %v4572_v59 }
 0x5ed   :  { %v3067_v53 = vpop.f32.mrf.mxu0 }
 0x5ee   :  { %v3068_v28 = vadd.f32 %v3067_v53, %v3066_v15  ;;  %v925_v20 = vpop.f32.mrf.mxu1  ;;  %v931_v17 = vadd.f32 %v3569_v12, %v882_v0 }
 0x5ef   :  { %v926_v30 = vadd.f32 %v925_v20, %v877_v29 }
 0x5f0   :  { %v885_v56 = vadd.f32 %v3068_v28, %v4572_v59 }
 0x5f1   :  { %v937_v61 = vadd.f32 %v926_v30, %v923_v1 }
 0x5f2   :  { %v934_v62 = vadd.f32 %v3570_v9, %v885_v56 }
 0x5f3   :  { %v938_v63 = vadd.f32 %v937_v61, %v931_v17 }
 0x5f5   :  { %v939_v11 = vadd.f32 %v938_v63, %v934_v62 }
 0x5f7   :  { %v940_v21 = vrot.slane %v939_v11, 4 }
 0x5f9   :  { %v941_v60 = vadd.f32 %v940_v21, %v939_v11 }
 0x5fb   :  { %v942_v58 = vrot.slane %v941_v60, 2 }
 0x5fd   :  { %v943_v57 = vadd.f32 %v942_v58, %v941_v60 }
 0x5ff   :  { %v944_v54 = vrot.slane %v943_v57, 1 }
 0x601   :  { %v945_v13 = vadd.f32 %v944_v54, %v943_v57 }
 0x603   :  { %3604 = vmatmul.mubr.f32.vlgmr.msra.gmra.mxu0 %v945_v13 }
 0x604   :  { %3645 = vmatprep.mubr.msk.bf16.mxu0 %vm235_vm1, %v4716_v14 }
 0x6c3   :  { %v1012_v20 = vpop.f32.mrf.mxu0 }
 0x6c4   :  { %v1016_v28 = vmul.f32 0.001953125, %v1012_v20 }
 0x6c5   :  { %v3605_v56 = vpop.f32.mrf.mxu0 }
 0x6c6   :  { %v1020_v12 = vrot.slane %v1016_v28, %v4580_v22 }
 0x6c8   :  { %v1021_v19 = vsub.f32 %v923_v1, %v1020_v12  ;;  %v1022_v15 = vsub.f32 %v926_v30, %v1020_v12  ;;  %v1023_v9 = vsub.f32 %v931_v17, %v1020_v12  ;;  %v1024_v58 = vsub.f32 %v934_v62, %v1020_v12 }
 0x6ca   :  { %v1025_v60 = vmul.f32 %v1021_v19, %v1021_v19  ;;  %v1026_v54 = vmul.f32 %v1022_v15, %v1022_v15  ;;  %v1027_v0 = vmul.f32 %v1023_v9, %v1023_v9  ;;  %v1028_v53 = vmul.f32 %v1024_v58, %v1024_v58 }
 0x6cc   :  { %v1029_v25 = vadd.f32 %v1026_v54, %v1025_v60  ;;  %v4121_v60 = vld [vmem:[%s5479_s3 + $0xb0] sm:$0xff]   ;;  %v4122_v54 = vld [vmem:[%s5479_s3 + $0xa8] sm:$0xff]  }
 0x6ce   :  { %v1030_v29 = vadd.f32 %v1029_v25, %v1027_v0 }
 0x6d0   :  { %v1031_v61 = vadd.f32 %v1030_v29, %v1028_v53 }
 0x6d2   :  { %v1032_v63 = vrot.slane %v1031_v61, 4 }
 0x6d4   :  { %v1033_v11 = vadd.f32 %v1032_v63, %v1031_v61 }
 0x6d6   :  { %v1034_v21 = vrot.slane %v1033_v11, 2 }
 0x6d8   :  { %v1035_v57 = vadd.f32 %v1034_v21, %v1033_v11 }
 0x6da   :  { %v1036_v13 = vrot.slane %v1035_v57, 1 }
 0x6dc   :  { %v1037_v20 = vadd.f32 %v1036_v13, %v1035_v57 }
 0x6de   :  { %3639 = vmatmul.mubr.f32.vlgmr.msra.gmra.mxu1 %v1037_v20 }
 0x6df   :  { %3120 = vmatpush3.bf16.msra.mxu1 %v4292_v33 }
 0x6e0   :  { %3121 = vmatprep.subr.bf16.mxu1 %v4298_v34 }
 0x6e3   :  { %3122 = vmatpush3.bf16.msra.mxu1 %v4308_v35 }
 0x6e4   :  { %3123 = vmatprep.subr.bf16.mxu1 %v4314_v36 }
 0x6e7   :  { %3124 = vmatpush3.bf16.msra.mxu1 %v4325_v38 }
 0x6e8   :  { %3125 = vmatprep.subr.bf16.mxu1 %v4331_v39 }
 0x6eb   :  { %3126 = vmatpush3.bf16.msra.mxu1 %v4339_v40 }
 0x6ec   :  { %3127 = vmatprep.subr.bf16.mxu1 %v4345_v41 }
 0x6ef   :  { %3128 = vmatpush3.bf16.msra.mxu1 %v4351_v42 }
 0x6f0   :  { %3129 = vmatprep.subr.bf16.mxu1 %v4357_v43 }
 0x6f3   :  { %3130 = vmatpush3.bf16.msra.mxu1 %v4363_v44 }
 0x6f4   :  { %3131 = vmatprep.subr.bf16.mxu1 %v4370_v45 }
 0x6f7   :  { %3132 = vmatpush3.bf16.msra.mxu1 %v4375_v46 }
 0x6f8   :  { %3133 = vmatprep.subr.bf16.mxu1 %v4389_v48 }
 0x6fb   :  { %3134 = vmatpush3.bf16.msra.mxu1 %v4394_v49 }
 0x6fc   :  { %3673 = vmatprep.subr.mxu1 %v5569_v18 }
 0x79e   :  { %v1104_v33 = vpop.f32.mrf.mxu1 }
 0x79f   :  { %v1108_v34 = vmul.f32 0.001953125, %v1104_v33 }
 0x7a0   :  { %v3640_v35 = vpop.f32.mrf.mxu1 }
 0x7a1   :  { %v1109_v36 = vadd.f32 1e-05, %v1108_v34 }
 0x7a3   :  { %4109 = vrsqrt.f32 %v1109_v36 }
 0x7b0   :  { %v4110_v38 = vpop.eup %4109 }
 0x7b1   :  { %v1111_v39 = vmul.f32 %v4110_v38, %v4602_v55 }
 0x7b3   :  { %v1116_v40 = vrot.slane %v1111_v39, %v4580_v22 }
 0x7b5   :  { %v1120_v41 = vmul.f32 %v1116_v40, %v1023_v9  ;;  %v1121_v42 = vmul.f32 %v1116_v40, %v1024_v58  ;;  %v1118_v43 = vmul.f32 %v1116_v40, %v1021_v19  ;;  %v1119_v44 = vmul.f32 %v1116_v40, %v1022_v15  ;;  %v4120_v58 = vld [vmem:[%s5479_s3 + $0xb8] sm:$0xff]  }
 0x7b7   :  { %v1124_v45 = vadd.f32 %v4609_v16, %v1120_v41  ;;  %v1125_v46 = vadd.f32 %v4609_v16, %v1121_v42  ;;  %v1122_v48 = vadd.f32 %v4609_v16, %v1118_v43  ;;  %v1123_v49 = vadd.f32 %v4609_v16, %v1119_v44 }
 0x7b9   :  { %v1128_v30 = vmax.f32 %v1124_v45, 0.0  ;;  %v1129_v1 = vmax.f32 %v1125_v46, 0.0  ;;  %v1126_v17 = vmax.f32 %v1122_v48, 0.0  ;;  %v1127_v62 = vmax.f32 %v1123_v49, 0.0 }
 0x7bb   :  { %v1132_v28 = vadd.f32 %v1128_v30, %v4258_v23  ;;  %v1133_v56 = vadd.f32 %v1129_v1, %v4260_v24  ;;  %v1130_v12 = vadd.f32 %v1126_v17, %v4262_v26  ;;  %v1131_v19 = vadd.f32 %v1127_v62, %v4264_v27 }
 0x7bd   :  { %v1135_v15 = vpack.c.bf16 %v1133_v56, %v1132_v28  ;;  %v1134_v9 = vpack.c.bf16 %v1131_v19, %v1130_v12 }
 0x7bf   :  { %3641 = vmatprep.subr.bf16.mxu0 %v1135_v15  ;;  %1237 = vmatprep.mubr.bf16.mxu1 %v1134_v9 }
 0x7c0   :  { %3642 = vmatpush3.bf16.msra.mxu0 %v1135_v15 }
 0x7c1   :  { %3643 = vmatprep.subr.bf16.mxu0 %v1134_v9 }
 0x7c4   :  { %3644 = vmatpush3.bf16.msra.mxu0 %v1134_v9 }
 0x7c5   :  { %3653 = vmatprep.subr.bf16.mxu0 %v4120_v58 }
 0x7c7   :  { %3646 = vmatmul.mubr.msk.bf16.vlgmr.msra.gmra.mxu0 %vm235_vm1, %v4282_v31  ;;  %v4123_v31 = vld [vmem:[%s5479_s3 + $0xa0] sm:$0xff]  }
 0x7c8   :  { %3649 = vmatprep.mubr.msk.bf16.mxu0 %vm235_vm1, %v4287_v32  ;;  %3654 = vmatpush3.bf16.msra.mxu0 %v4120_v58 }
 0x7c9   :  { %3655 = vmatprep.subr.bf16.mxu0 %v4121_v60 }
 0x7cc   :  { %3656 = vmatpush3.bf16.msra.mxu0 %v4121_v60 }
 0x7cd   :  { %3657 = vmatprep.subr.bf16.mxu0 %v4122_v54 }
 0x7cf   :  { %3650 = vmatmul.mubr.msk.bf16.gmra.mxu0 %vm235_vm1, %v4319_v37 }
 0x7d0   :  { %3658 = vmatpush3.bf16.msra.mxu0 %v4122_v54 }
 0x7d1   :  { %3659 = vmatprep.subr.bf16.mxu0 %v4123_v31 }
 0x7d4   :  { %3660 = vmatpush3.bf16.msra.mxu0 %v4123_v31 }
 0x7d5   :  { %3661 = vmatprep.subr.bf16.mxu0 %v4380_v47 }
 0x7d8   :  { %3662 = vmatpush3.bf16.msra.mxu0 %v4380_v47 }
 0x7d9   :  { %3663 = vmatprep.subr.bf16.mxu0 %v4399_v50 }
 0x7dc   :  { %3664 = vmatpush3.bf16.msra.mxu0 %v4399_v50 }
 0x7dd   :  { %3665 = vmatprep.subr.bf16.mxu0 %v4408_v51 }
 0x7e0   :  { %3666 = vmatpush3.bf16.msra.mxu0 %v4408_v51 }
 0x7e1   :  { %3667 = vmatprep.subr.bf16.mxu0 %v4415_v52 }
 0x7e4   :  { %3668 = vmatpush3.bf16.msra.mxu0 %v4415_v52 }
 0x7e5   :  { %3708 = vmatprep.subr.mxu0 %v5569_v18 }
 0x887   :  { %v3647_v32 = vpop.f32.mrf.mxu0 }
 0x889   :  { %v1170_v37 = vpop.f32.mrf.mxu0 }
 0x88b   :  { %v3648_v0 = vpop.f32.mrf.mxu0 }
 0x88c   :  { %v1202_v52 = vpack.c.bf16 %v3648_v0, %v3647_v32 }
 0x88d   :  { %v1173_v25 = vpop.f32.mrf.mxu0 }
 0x88e   :  { %v1201_v53 = vpack.c.bf16 %v1173_v25, %v1170_v37 }
 0x88f   :  { %v3651_v47 = vpop.f32.mrf.mxu0 }
 0x890   :  { %1238 = vmatmul.mubr.bf16.vlgmr.msra.gmra.mxu1 %v1201_v53 }
 0x891   :  { %v1186_v29 = vpop.f32.mrf.mxu0  ;;  %1245 = vmatprep.mubr.bf16.mxu1 %v1135_v15  ;;  %3674 = vmatpush3.msra.mxu1 %v4424_v2 }
 0x892   :  { %3675 = vmatprep.subr.mxu1 %v5569_v18 }
 0x893   :  { %v3652_v50 = vpop.f32.mrf.mxu0  ;;  %3676 = vmatpush3.msra.mxu1 %v4433_v3 }
 0x894   :  { %3677 = vmatprep.subr.mxu1 %v5569_v18  ;;  %v1204_v63 = vpack.c.bf16 %v3652_v50, %v3651_v47 }
 0x895   :  { %v1189_v51 = vpop.f32.mrf.mxu0  ;;  %3678 = vmatpush3.msra.mxu1 %v4442_v4 }
 0x896   :  { %v1203_v61 = vpack.c.bf16 %v1189_v51, %v1186_v29  ;;  %3679 = vmatprep.subr.mxu1 %v5569_v18 }
 0x897   :  { %3680 = vmatpush3.msra.mxu1 %v4451_v5 }
 0x898   :  { %1246 = vmatmul.mubr.bf16.gmra.mxu1 %v1202_v52  ;;  %3669 = vmatprep.mubr.bf16.mxu0 %v1203_v61 }
 0x899   :  { %3670 = vmatmul.mubr.bf16.vlgmr.msra.gmra.mxu0 %v1204_v63  ;;  %3681 = vmatprep.subr.mxu1 %v5569_v18 }
 0x89a   :  { %3682 = vmatpush3.msra.mxu1 %v4460_v6  ;;  %3705 = vmatprep.mubr.msk.f32.mxu1 %vm4145_vm2, %v5569_v18 }
 0x89b   :  { %3683 = vmatprep.subr.mxu1 %v5569_v18  ;;  %3709 = vmatpush3.msra.mxu0 %v4424_v2  ;;  %v5580_v2 = vld [vmem:[#allocation8_spill] sm:$0xff] }
 0x89c   :  { %3684 = vmatpush3.msra.mxu1 %v4469_v7  ;;  %3710 = vmatprep.subr.mxu0 %v5569_v18 }
 0x89d   :  { %3685 = vmatprep.subr.mxu1 %v5569_v18  ;;  %3711 = vmatpush3.msra.mxu0 %v4433_v3  ;;  %v5581_v3 = vld [vmem:[#allocation9_spill] sm:$0xff] }
 0x89e   :  { %3686 = vmatpush3.msra.mxu1 %v4478_v8  ;;  %3712 = vmatprep.subr.mxu0 %v5569_v18 }
 0x89f   :  { %3687 = vmatprep.subr.mxu1 %v5569_v18  ;;  %3713 = vmatpush3.msra.mxu0 %v4442_v4  ;;  %v5582_v4 = vld [vmem:[#allocation10_spill] sm:$0xff] }
 0x8a0   :  { %3688 = vmatpush3.msra.mxu1 %v5570_v10  ;;  %3714 = vmatprep.subr.mxu0 %v5569_v18 }
 0x8a1   :  { %3689 = vmatprep.subr.mxu1 %v5569_v18  ;;  %3715 = vmatpush3.msra.mxu0 %v4451_v5  ;;  %v5583_v5 = vld [vmem:[#allocation11_spill] sm:$0xff] }
 0x8a2   :  { %3690 = vmatpush3.msra.mxu1 %v5580_v2  ;;  %3716 = vmatprep.subr.mxu0 %v5569_v18 }
 0x8a3   :  { %3691 = vmatprep.subr.mxu1 %v5569_v18  ;;  %3717 = vmatpush3.msra.mxu0 %v4460_v6  ;;  %v5584_v6 = vld [vmem:[#allocation12_spill] sm:$0xff] }
 0x8a4   :  { %3692 = vmatpush3.msra.mxu1 %v5581_v3  ;;  %3718 = vmatprep.subr.mxu0 %v5569_v18 }
 0x8a5   :  { %3693 = vmatprep.subr.mxu1 %v5569_v18  ;;  %3719 = vmatpush3.msra.mxu0 %v4469_v7  ;;  %v5585_v7 = vld [vmem:[#allocation13_spill] sm:$0xff] }
 0x8a6   :  { %3694 = vmatpush3.msra.mxu1 %v5582_v4  ;;  %3720 = vmatprep.subr.mxu0 %v5569_v18 }
 0x8a7   :  { %3695 = vmatprep.subr.mxu1 %v5569_v18  ;;  %3721 = vmatpush3.msra.mxu0 %v4478_v8  ;;  %v5586_v8 = vld [vmem:[#allocation14_spill] sm:$0xff] }
 0x8a8   :  { %3696 = vmatpush3.msra.mxu1 %v5583_v5  ;;  %3722 = vmatprep.subr.mxu0 %v5569_v18 }
 0x8a9   :  { %3697 = vmatprep.subr.mxu1 %v5569_v18  ;;  %3723 = vmatpush3.msra.mxu0 %v5570_v10  ;;  %v5587_v10 = vld [vmem:[#allocation15_spill] sm:$0xff] }
 0x8aa   :  { %3698 = vmatpush3.msra.mxu1 %v5584_v6  ;;  %3724 = vmatprep.subr.mxu0 %v5569_v18 }
 0x8ab   :  { %3699 = vmatprep.subr.mxu1 %v5569_v18  ;;  %3725 = vmatpush3.msra.mxu0 %v5580_v2 }
 0x8ac   :  { %3700 = vmatpush3.msra.mxu1 %v5585_v7  ;;  %3726 = vmatprep.subr.mxu0 %v5569_v18 }
 0x8ad   :  { %3701 = vmatprep.subr.mxu1 %v5569_v18  ;;  %3727 = vmatpush3.msra.mxu0 %v5581_v3 }
 0x8ae   :  { %3702 = vmatpush3.msra.mxu1 %v5586_v8  ;;  %3728 = vmatprep.subr.mxu0 %v5569_v18 }
 0x8af   :  { %3703 = vmatprep.subr.mxu1 %v5569_v18  ;;  %3729 = vmatpush3.msra.mxu0 %v5582_v4 }
 0x8b0   :  { %3704 = vmatpush3.msra.mxu1 %v5587_v10  ;;  %3730 = vmatprep.subr.mxu0 %v5569_v18 }
 0x8b1   :  { %3731 = vmatpush3.msra.mxu0 %v5583_v5  ;;  %3740 = vmatprep.mubr.msk.f32.mxu0 %vm4145_vm2, %v5569_v18 }
 0x8b2   :  { %3732 = vmatprep.subr.mxu0 %v5569_v18 }
 0x8b3   :  { %3733 = vmatpush3.msra.mxu0 %v5584_v6 }
 0x8b4   :  { %3734 = vmatprep.subr.mxu0 %v5569_v18 }
 0x8b5   :  { %3735 = vmatpush3.msra.mxu0 %v5585_v7 }
 0x8b6   :  { %3736 = vmatprep.subr.mxu0 %v5569_v18 }
 0x8b7   :  { %3737 = vmatpush3.msra.mxu0 %v5586_v8 }
 0x8b8   :  { %3738 = vmatprep.subr.mxu0 %v5569_v18 }
 0x8b9   :  { %3739 = vmatpush3.msra.mxu0 %v5587_v10  ;;  %v4850_v10 = vld [vmem:[%s5479_s3 + $0x138] sm:$0xff]  }
 0x8ba   :  { %5588 = vst [vmem:[#allocation7_spill] sm:$0xff] %v4850_v10  ;;  %3197 = vmatprep.subr.bf16.mxu0 %v4850_v10 }
 0x950   :  { %v3135_v11 = vpop.f32.mrf.mxu1 }
 0x952   :  { %v3136_v21 = vpop.f32.mrf.mxu1 }
 0x953   :  { %v3137_v34 = vadd.f32 %v3136_v21, %v3135_v11  ;;  %v4855_v11 = vld [vmem:[%s5479_s3 + $0xf8] sm:$0xff]   ;;  %v4860_v21 = vld [vmem:[%s5479_s3 + $0x130] sm:$0xff]  }
 0x954   :  { %v3138_v57 = vpop.f32.mrf.mxu1 }
 0x955   :  { %v1240_v43 = vadd.f32 %v3137_v34, %v4572_v59  ;;  %v4891_v34 = vld [vmem:[%s5479_s3 + $0xe0] sm:$0xff]  }
 0x956   :  { %v3139_v13 = vpop.f32.mrf.mxu1 }
 0x957   :  { %v3140_v35 = vadd.f32 %v3139_v13, %v3138_v57  ;;  %v4867_v57 = vld [vmem:[%s5479_s3 + $0xf0] sm:$0xff]   ;;  %v4873_v13 = vld [vmem:[%s5479_s3 + $0x128] sm:$0xff]  }
 0x958   :  { %v3141_v20 = vpop.f32.mrf.mxu1 }
 0x959   :  { %v3671_v33 = vpop.f32.mrf.mxu0  ;;  %v1243_v45 = vadd.f32 %v3140_v35, %v4572_v59  ;;  %v4897_v35 = vld [vmem:[%s5479_s3 + $0x118] sm:$0xff]  }
 0x95a   :  { %v3142_v36 = vpop.f32.mrf.mxu1 }
 0x95b   :  { %v3143_v38 = vadd.f32 %v3142_v36, %v3141_v20  ;;  %v1288_v39 = vpop.f32.mrf.mxu0  ;;  %v4879_v20 = vld [vmem:[%s5479_s3 + $0xe8] sm:$0xff]   ;;  %v4903_v36 = vld [vmem:[%s5479_s3 + $0xd8] sm:$0xff]  }
 0x95c   :  { %v3144_v40 = vpop.f32.mrf.mxu1  ;;  %v1289_v49 = vadd.f32 %v1288_v39, %v1240_v43  ;;  %v4915_v39 = vld [vmem:[%s5479_s3 + $0xd0] sm:$0xff]  }
 0x95d   :  { %v3672_v41 = vpop.f32.mrf.mxu0  ;;  %v1248_v42 = vadd.f32 %v3143_v38, %v4572_v59  ;;  %v4909_v38 = vld [vmem:[%s5479_s3 + $0x110] sm:$0xff]  }
 0x95e   :  { %v3145_v44 = vpop.f32.mrf.mxu1 }
 0x95f   :  { %v3146_v46 = vadd.f32 %v3145_v44, %v3144_v40  ;;  %v1291_v48 = vpop.f32.mrf.mxu0  ;;  %v1297_v17 = vadd.f32 %v3671_v33, %v1248_v42  ;;  %v4885_v33 = vld [vmem:[%s5479_s3 + $0x120] sm:$0xff]  }
 0x960   :  { %v1292_v30 = vadd.f32 %v1291_v48, %v1243_v45 }
 0x961   :  { %v1251_v1 = vadd.f32 %v3146_v46, %v4572_v59 }
 0x962   :  { %v1303_v62 = vadd.f32 %v1292_v30, %v1289_v49 }
 0x963   :  { %v1300_v28 = vadd.f32 %v3672_v41, %v1251_v1 }
 0x964   :  { %v1304_v56 = vadd.f32 %v1303_v62, %v1297_v17 }
 0x966   :  { %v1305_v12 = vadd.f32 %v1304_v56, %v1300_v28 }
 0x968   :  { %v1306_v19 = vrot.slane %v1305_v12, 4 }
 0x96a   :  { %v1307_v15 = vadd.f32 %v1306_v19, %v1305_v12 }
 0x96c   :  { %v1308_v9 = vrot.slane %v1307_v15, 2 }
 0x96e   :  { %v1309_v58 = vadd.f32 %v1308_v9, %v1307_v15 }
 0x970   :  { %v1310_v60 = vrot.slane %v1309_v58, 1 }
 0x972   :  { %v1311_v54 = vadd.f32 %v1310_v60, %v1309_v58  ;;  %v4946_v60 = vld [vmem:[%s5479_s3 + $0x170] sm:$0xff]  }
 0x974   :  { %3706 = vmatmul.mubr.f32.vlgmr.msra.gmra.mxu1 %v1311_v54  ;;  %v4951_v54 = vld [vmem:[%s5478_s7 + $0x8] sm:$0xff]  }
 0x975   :  { %3747 = vmatprep.mubr.msk.bf16.mxu1 %vm235_vm1, %v4716_v14 }
 0xa34   :  { %v1378_v31 = vpop.f32.mrf.mxu1 }
 0xa35   :  { %v1382_v32 = vmul.f32 0.001953125, %v1378_v31  ;;  %v4958_v31 = vld [vmem:[%s5478_s7 + $0x10] sm:$0xff]  }
 0xa36   :  { %v3707_v37 = vpop.f32.mrf.mxu1 }
 0xa37   :  { %v1386_v59 = vrot.slane %v1382_v32, %v4580_v22  ;;  %v4967_v32 = vld [vmem:[%s5479_s3 + $0x168] sm:$0xff]   ;;  %v4974_v37 = vld [vmem:[%s5479_s3 + $0x160] sm:$0xff]  }
 0xa39   :  { %v1387_v0 = vsub.f32 %v1289_v49, %v1386_v59  ;;  %v1388_v25 = vsub.f32 %v1292_v30, %v1386_v59  ;;  %v1389_v53 = vsub.f32 %v1297_v17, %v1386_v59  ;;  %v1390_v47 = vsub.f32 %v1300_v28, %v1386_v59  ;;  %v4979_v59 = vld [vmem:[%s5478_s7 + $0x18] sm:$0xff]  }
 0xa3b   :  { %v1391_v29 = vmul.f32 %v1387_v0, %v1387_v0  ;;  %v1392_v50 = vmul.f32 %v1388_v25, %v1388_v25  ;;  %v1393_v51 = vmul.f32 %v1389_v53, %v1389_v53  ;;  %v1394_v61 = vmul.f32 %v1390_v47, %v1390_v47 }
 0xa3d   :  { %v1395_v52 = vadd.f32 %v1392_v50, %v1391_v29  ;;  %v5013_v29 = vld [vmem:[%s5479_s3 + $0xc0] sm:$0xff]   ;;  %v5018_v50 = vld [vmem:[%s5479_s3 + $0x150] sm:$0xff]  }
 0xa3f   :  { %v1396_v63 = vadd.f32 %v1395_v52, %v1393_v51  ;;  %v5028_v51 = vld [vmem:[%s5479_s3 + $0x148] sm:$0xff]   ;;  %v5035_v52 = vld [vmem:[%s5479_s3 + $0x140] sm:$0xff]  }
 0xa41   :  { %v1397_v2 = vadd.f32 %v1396_v63, %v1394_v61 }
 0xa43   :  { %v1398_v3 = vrot.slane %v1397_v2, 4 }
 0xa45   :  { %v1399_v4 = vadd.f32 %v1398_v3, %v1397_v2 }
 0xa47   :  { %v1400_v5 = vrot.slane %v1399_v4, 2 }
 0xa49   :  { %v1401_v6 = vadd.f32 %v1400_v5, %v1399_v4 }
 0xa4b   :  { %v1402_v7 = vrot.slane %v1401_v6, 1 }
 0xa4d   :  { %v1403_v8 = vadd.f32 %v1402_v7, %v1401_v6  ;;  %v5043_v7 = vld [vmem:[%s5481_s8 + $0x78] sm:$0xff] }
 0xa4f   :  { %3741 = vmatmul.mubr.f32.vlgmr.msra.gmra.mxu0 %v1403_v8 }
 0xa50   :  { %3198 = vmatpush3.bf16.msra.mxu0 %v4855_v11 }
 0xa51   :  { %3199 = vmatprep.subr.bf16.mxu0 %v4860_v21 }
 0xa54   :  { %3200 = vmatpush3.bf16.msra.mxu0 %v4867_v57 }
 0xa55   :  { %3201 = vmatprep.subr.bf16.mxu0 %v4873_v13 }
 0xa58   :  { %3202 = vmatpush3.bf16.msra.mxu0 %v4879_v20 }
 0xa59   :  { %3203 = vmatprep.subr.bf16.mxu0 %v4885_v33 }
 0xa5c   :  { %3204 = vmatpush3.bf16.msra.mxu0 %v4891_v34 }
 0xa5d   :  { %3205 = vmatprep.subr.bf16.mxu0 %v4897_v35 }
 0xa60   :  { %3206 = vmatpush3.bf16.msra.mxu0 %v4903_v36 }
 0xa61   :  { %3207 = vmatprep.subr.bf16.mxu0 %v4909_v38 }
 0xa64   :  { %3208 = vmatpush3.bf16.msra.mxu0 %v4915_v39 }
 0xb0f   :  { %v1470_v40 = vpop.f32.mrf.mxu0 }
 0xb10   :  { %v1474_v41 = vmul.f32 0.001953125, %v1470_v40  ;;  %v5050_v40 = vld [vmem:[%s5481_s8 + $0x70] sm:$0xff] }
 0xb11   :  { %v3742_v42 = vpop.f32.mrf.mxu0 }
 0xb12   :  { %v1475_v43 = vadd.f32 1e-05, %v1474_v41  ;;  %v5057_v42 = vld [vmem:[%s5481_s8 + $0x68] sm:$0xff] }
 0xb14   :  { %4111 = vrsqrt.f32 %v1475_v43 }
 0xb21   :  { %v4112_v44 = vpop.eup %4111 }
 0xb22   :  { %v1477_v45 = vmul.f32 %v4112_v44, %v4602_v55 }
 0xb24   :  { %v1482_v46 = vrot.slane %v1477_v45, %v4580_v22 }
 0xb26   :  { %v1486_v48 = vmul.f32 %v1482_v46, %v1389_v53  ;;  %v1487_v49 = vmul.f32 %v1482_v46, %v1390_v47  ;;  %v1484_v30 = vmul.f32 %v1482_v46, %v1387_v0  ;;  %v1485_v1 = vmul.f32 %v1482_v46, %v1388_v25  ;;  %v4989_v0 = vld [vmem:[%s5479_s3 + $0x108] sm:$0xff]   ;;  %v4999_v53 = vld [vmem:[%s5479_s3 + $0x158] sm:$0xff]   ;;  %v5008_v47 = vld [vmem:[%s5479_s3 + $0x100] sm:$0xff]  }
 0xb27   :  { %v4994_v25 = vld [vmem:[%s5479_s3 + $0xc8] sm:$0xff]   ;;  %3209 = vmatprep.subr.bf16.mxu0 %v4989_v0  ;;  %v5064_v46 = vld [vmem:[%s5481_s8 + $0x60] sm:$0xff] }
 0xb28   :  { %v1490_v17 = vadd.f32 %v4609_v16, %v1486_v48  ;;  %v1491_v62 = vadd.f32 %v4609_v16, %v1487_v49  ;;  %v1488_v28 = vadd.f32 %v4609_v16, %v1484_v30  ;;  %v1489_v56 = vadd.f32 %v4609_v16, %v1485_v1  ;;  %v4940_v16 = vld [vmem:[%s5479_s3 + $0x178] sm:$0xff]   ;;  %3210 = vmatpush3.bf16.msra.mxu0 %v4994_v25  ;;  %v5081_v49 = vld [vmem:[%s5481_s8 + $0x50] sm:$0xff]  ;;  %v5090_v30 = vld [vmem:[%s5481_s8 + $0x48] sm:$0xff] }
 0xb29   :  { %3211 = vmatprep.subr.bf16.mxu0 %v5008_v47  ;;  %v5071_v48 = vld [vmem:[%s5481_s8 + $0x58] sm:$0xff]  ;;  %5590 = vst [vmem:[#allocation8_spill] sm:$0xff] %v5081_v49  ;;  %5591 = vst [vmem:[#allocation9_spill] sm:$0xff] %v5090_v30  ;;  %v5099_v1 = vld [vmem:[%s5481_s8 + $0x40] sm:$0xff] }
 0xb2a   :  { %v4925_v12 = vmax.f32 %v1490_v17, 0.0  ;;  %v4927_v19 = vmax.f32 %v1491_v62, 0.0  ;;  %v4929_v15 = vmax.f32 %v1488_v28, 0.0  ;;  %v4931_v55 = vmax.f32 %v1489_v56, 0.0  ;;  %5589 = vst [vmem:[#allocation6_spill] sm:$0xff] %v5071_v48  ;;  %5592 = vst [vmem:[#allocation10_spill] sm:$0xff] %v5099_v1 }
 0xb2b   :  { %v5108_v17 = vld [vmem:[%s5481_s8 + $0x38] sm:$0xff]  ;;  %v5117_v62 = vld [vmem:[%s5481_s8 + $0x30] sm:$0xff]  ;;  %v5126_v28 = vld [vmem:[%s5481_s8 + $0x28] sm:$0xff] }
 0xb2c   :  { %v1552_v9 = vpack.c.bf16 %v4927_v19, %v4925_v12  ;;  %v1551_v58 = vpack.c.bf16 %v4931_v55, %v4929_v15  ;;  %3212 = vmatpush3.bf16.msra.mxu0 %v5013_v29  ;;  %5593 = vst [vmem:[#allocation11_spill] sm:$0xff] %v5108_v17  ;;  %5594 = vst [vmem:[#allocation12_spill] sm:$0xff] %v5117_v62  ;;  %v5135_v56 = vld [vmem:[%s5481_s8 + $0x20] sm:$0xff] }
 0xb2d   :  { %3775 = vmatprep.subr.mxu0 %v5569_v18  ;;  %5595 = vst [vmem:[#allocation13_spill] sm:$0xff] %v5126_v28  ;;  %5596 = vst [vmem:[#allocation14_spill] sm:$0xff] %v5135_v56 }
 0xb2e   :  { %3743 = vmatprep.subr.bf16.mxu1 %v1552_v9  ;;  %1804 = vmatprep.mubr.bf16.mxu0 %v1551_v58 }
 0xb2f   :  { %3744 = vmatpush3.bf16.msra.mxu1 %v1552_v9 }
 0xb30   :  { %3745 = vmatprep.subr.bf16.mxu1 %v1551_v58 }
 0xb33   :  { %3746 = vmatpush3.bf16.msra.mxu1 %v1551_v58  ;;  %v5153_v58 = vld [vmem:[%s5481_s8 + $0x10] sm:$0xff] }
 0xb34   :  { %3755 = vmatprep.subr.bf16.mxu1 %v4940_v16  ;;  %5598 = vst [vmem:[#allocation16_spill] sm:$0xff] %v5153_v58 }
 0xb36   :  { %3748 = vmatmul.mubr.msk.bf16.vlgmr.msra.gmra.mxu1 %vm235_vm1, %v4951_v54 }
 0xb37   :  { %3751 = vmatprep.mubr.msk.bf16.mxu1 %vm235_vm1, %v4958_v31  ;;  %3756 = vmatpush3.bf16.msra.mxu1 %v4940_v16 }
 0xb38   :  { %3757 = vmatprep.subr.bf16.mxu1 %v4946_v60 }
 0xb3b   :  { %3758 = vmatpush3.bf16.msra.mxu1 %v4946_v60 }
 0xb3c   :  { %3759 = vmatprep.subr.bf16.mxu1 %v4967_v32 }
 0xb3e   :  { %3752 = vmatmul.mubr.msk.bf16.gmra.mxu1 %vm235_vm1, %v4979_v59 }
 0xb3f   :  { %3760 = vmatpush3.bf16.msra.mxu1 %v4967_v32 }
 0xb40   :  { %3761 = vmatprep.subr.bf16.mxu1 %v4974_v37 }
 0xb43   :  { %3762 = vmatpush3.bf16.msra.mxu1 %v4974_v37 }
 0xb44   :  { %3763 = vmatprep.subr.bf16.mxu1 %v4999_v53 }
 0xb47   :  { %3764 = vmatpush3.bf16.msra.mxu1 %v4999_v53 }
 0xb48   :  { %3765 = vmatprep.subr.bf16.mxu1 %v5018_v50 }
 0xb4b   :  { %3766 = vmatpush3.bf16.msra.mxu1 %v5018_v50 }
 0xb4c   :  { %3767 = vmatprep.subr.bf16.mxu1 %v5028_v51 }
 0xb4f   :  { %3768 = vmatpush3.bf16.msra.mxu1 %v5028_v51 }
 0xb50   :  { %3769 = vmatprep.subr.bf16.mxu1 %v5035_v52 }
 0xb53   :  { %3770 = vmatpush3.bf16.msra.mxu1 %v5035_v52 }
 0xb54   :  { %3810 = vmatprep.subr.mxu1 %v5569_v18 }
 0xbf6   :  { %v3749_v61 = vpop.f32.mrf.mxu1 }
 0xbf8   :  { %v1587_v63 = vpop.f32.mrf.mxu1 }
 0xbfa   :  { %v3750_v2 = vpop.f32.mrf.mxu1 }
 0xbfb   :  { %v1619_v43 = vpack.c.bf16 %v3750_v2, %v3749_v61  ;;  %v5162_v61 = vld [vmem:[%s5481_s8 + $0x8] sm:$0xff] }
 0xbfc   :  { %v1590_v3 = vpop.f32.mrf.mxu1  ;;  %5599 = vst [vmem:[#allocation17_spill] sm:$0xff] %v5162_v61 }
 0xbfd   :  { %v1618_v4 = vpack.c.bf16 %v1590_v3, %v1587_v63  ;;  %v5171_v63 = vld [vmem:[%s5481_s8] sm:$0xff] }
 0xbfe   :  { %v3753_v5 = vpop.f32.mrf.mxu1  ;;  %5600 = vst [vmem:[#allocation18_spill] sm:$0xff] %v5171_v63 }
 0xbff   :  { %1805 = vmatmul.mubr.bf16.vlgmr.msra.gmra.mxu0 %v1618_v4 }
 0xc00   :  { %v1603_v6 = vpop.f32.mrf.mxu1  ;;  %1812 = vmatprep.mubr.bf16.mxu0 %v1552_v9  ;;  %3776 = vmatpush3.msra.mxu0 %v5043_v7  ;;  %v5144_v9 = vld [vmem:[%s5481_s8 + $0x18] sm:$0xff] }
 0xc01   :  { %3777 = vmatprep.subr.mxu0 %v5569_v18  ;;  %5597 = vst [vmem:[#allocation15_spill] sm:$0xff] %v5144_v9 }
 0xc02   :  { %v3754_v8 = vpop.f32.mrf.mxu1  ;;  %3778 = vmatpush3.msra.mxu0 %v5050_v40 }
 0xc03   :  { %3779 = vmatprep.subr.mxu0 %v5569_v18  ;;  %v1621_v45 = vpack.c.bf16 %v3754_v8, %v3753_v5 }
 0xc04   :  { %v1606_v41 = vpop.f32.mrf.mxu1  ;;  %3780 = vmatpush3.msra.mxu0 %v5057_v42 }
 0xc05   :  { %v1620_v44 = vpack.c.bf16 %v1606_v41, %v1603_v6  ;;  %3781 = vmatprep.subr.mxu0 %v5569_v18 }
 0xc06   :  { %3782 = vmatpush3.msra.mxu0 %v5064_v46 }
 0xc07   :  { %1813 = vmatmul.mubr.bf16.gmra.mxu0 %v1619_v43  ;;  %3771 = vmatprep.mubr.bf16.mxu1 %v1620_v44 }
 0xc08   :  { %3772 = vmatmul.mubr.bf16.vlgmr.msra.gmra.mxu1 %v1621_v45  ;;  %3783 = vmatprep.subr.mxu0 %v5569_v18  ;;  %v5190_v45 = vld [vmem:[%s5482_s4 + $0x1] ss:$0 sm:$0xff] }
 0xc09   :  { %3784 = vmatpush3.msra.mxu0 %v5071_v48  ;;  %3807 = vmatprep.mubr.msk.f32.mxu0 %vm4145_vm2, %v5569_v18 }
 0xc0a   :  { %3785 = vmatprep.subr.mxu0 %v5569_v18  ;;  %3811 = vmatpush3.msra.mxu1 %v5043_v7 }
 0xc0b   :  { %3786 = vmatpush3.msra.mxu0 %v5081_v49  ;;  %3812 = vmatprep.subr.mxu1 %v5569_v18 }
 0xc0c   :  { %3787 = vmatprep.subr.mxu0 %v5569_v18  ;;  %3813 = vmatpush3.msra.mxu1 %v5050_v40 }
 0xc0d   :  { %3788 = vmatpush3.msra.mxu0 %v5090_v30  ;;  %3814 = vmatprep.subr.mxu1 %v5569_v18 }
 0xc0e   :  { %3789 = vmatprep.subr.mxu0 %v5569_v18  ;;  %3815 = vmatpush3.msra.mxu1 %v5057_v42 }
 0xc0f   :  { %3790 = vmatpush3.msra.mxu0 %v5099_v1  ;;  %3816 = vmatprep.subr.mxu1 %v5569_v18 }
 0xc10   :  { %3791 = vmatprep.subr.mxu0 %v5569_v18  ;;  %3817 = vmatpush3.msra.mxu1 %v5064_v46 }
 0xc11   :  { %3792 = vmatpush3.msra.mxu0 %v5108_v17  ;;  %3818 = vmatprep.subr.mxu1 %v5569_v18 }
 0xc12   :  { %3793 = vmatprep.subr.mxu0 %v5569_v18  ;;  %3819 = vmatpush3.msra.mxu1 %v5071_v48 }
 0xc13   :  { %3794 = vmatpush3.msra.mxu0 %v5117_v62  ;;  %3820 = vmatprep.subr.mxu1 %v5569_v18 }
 0xc14   :  { %3795 = vmatprep.subr.mxu0 %v5569_v18  ;;  %3821 = vmatpush3.msra.mxu1 %v5081_v49 }
 0xc15   :  { %3796 = vmatpush3.msra.mxu0 %v5126_v28  ;;  %3822 = vmatprep.subr.mxu1 %v5569_v18 }
 0xc16   :  { %3797 = vmatprep.subr.mxu0 %v5569_v18  ;;  %3823 = vmatpush3.msra.mxu1 %v5090_v30 }
 0xc17   :  { %3798 = vmatpush3.msra.mxu0 %v5135_v56  ;;  %3824 = vmatprep.subr.mxu1 %v5569_v18 }
 0xc18   :  { %3799 = vmatprep.subr.mxu0 %v5569_v18  ;;  %3825 = vmatpush3.msra.mxu1 %v5099_v1 }
 0xc19   :  { %3800 = vmatpush3.msra.mxu0 %v5144_v9  ;;  %3826 = vmatprep.subr.mxu1 %v5569_v18 }
 0xc1a   :  { %3801 = vmatprep.subr.mxu0 %v5569_v18  ;;  %3827 = vmatpush3.msra.mxu1 %v5108_v17 }
 0xc1b   :  { %3802 = vmatpush3.msra.mxu0 %v5153_v58  ;;  %3828 = vmatprep.subr.mxu1 %v5569_v18 }
 0xc1c   :  { %3803 = vmatprep.subr.mxu0 %v5569_v18  ;;  %3829 = vmatpush3.msra.mxu1 %v5117_v62 }
 0xc1d   :  { %3804 = vmatpush3.msra.mxu0 %v5162_v61  ;;  %3830 = vmatprep.subr.mxu1 %v5569_v18 }
 0xc1e   :  { %3805 = vmatprep.subr.mxu0 %v5569_v18  ;;  %3831 = vmatpush3.msra.mxu1 %v5126_v28 }
 0xc1f   :  { %3806 = vmatpush3.msra.mxu0 %v5171_v63  ;;  %3832 = vmatprep.subr.mxu1 %v5569_v18 }
 0xc20   :  { %3833 = vmatpush3.msra.mxu1 %v5135_v56  ;;  %3842 = vmatprep.mubr.msk.f32.mxu1 %vm4145_vm2, %v5569_v18 }
 0xc21   :  { %3834 = vmatprep.subr.mxu1 %v5569_v18 }
 0xc22   :  { %3835 = vmatpush3.msra.mxu1 %v5144_v9 }
 0xc23   :  { %3836 = vmatprep.subr.mxu1 %v5569_v18 }
 0xc24   :  { %3837 = vmatpush3.msra.mxu1 %v5153_v58 }
 0xc25   :  { %3838 = vmatprep.subr.mxu1 %v5569_v18 }
 0xc26   :  { %3839 = vmatpush3.msra.mxu1 %v5162_v61 }
 0xc27   :  { %3840 = vmatprep.subr.mxu1 %v5569_v18 }
 0xc28   :  { %3841 = vmatpush3.msra.mxu1 %v5171_v63 }
 0xc29   :  { %3275 = vmatprep.subr.bf16.mxu1 %v4850_v10 }
 0xcbf   :  { %v3213_v2 = vpop.f32.mrf.mxu0 }
 0xcc1   :  { %v3214_v3 = vpop.f32.mrf.mxu0 }
 0xcc2   :  { %v3215_v41 = vadd.f32 %v3214_v3, %v3213_v2 }
 0xcc3   :  { %v3216_v4 = vpop.f32.mrf.mxu0 }
 0xcc4   :  { %v1807_v63 = vadd.f32 %v3215_v41, %v5190_v45 }
 0xcc5   :  { %v3217_v5 = vpop.f32.mrf.mxu0 }
 0xcc6   :  { %v3218_v43 = vadd.f32 %v3217_v5, %v3216_v4 }
 0xcc7   :  { %v3219_v6 = vpop.f32.mrf.mxu0 }
 0xcc8   :  { %v3773_v8 = vpop.f32.mrf.mxu1  ;;  %v1810_v58 = vadd.f32 %v3218_v43, %v5190_v45 }
 0xcc9   :  { %v3220_v44 = vpop.f32.mrf.mxu0 }
 0xcca   :  { %v3221_v24 = vadd.f32 %v3220_v44, %v3219_v6  ;;  %v1855_v23 = vpop.f32.mrf.mxu1 }
 0xccb   :  { %v3222_v27 = vpop.f32.mrf.mxu0  ;;  %v1856_v3 = vadd.f32 %v1855_v23, %v1807_v63 }
 0xccc   :  { %v3774_v26 = vpop.f32.mrf.mxu1  ;;  %v1815_v10 = vadd.f32 %v3221_v24, %v5190_v45 }
 0xccd   :  { %v3223_v61 = vpop.f32.mrf.mxu0 }
 0xcce   :  { %v3224_v9 = vadd.f32 %v3223_v61, %v3222_v27  ;;  %v1858_v2 = vpop.f32.mrf.mxu1  ;;  %v1864_v56 = vadd.f32 %v3773_v8, %v1815_v10 }
 0xccf   :  { %v1859_v4 = vadd.f32 %v1858_v2, %v1810_v58 }
 0xcd0   :  { %v1818_v5 = vadd.f32 %v3224_v9, %v5190_v45 }
 0xcd1   :  { %v1870_v28 = vadd.f32 %v1859_v4, %v1856_v3 }
 0xcd2   :  { %v1867_v62 = vadd.f32 %v3774_v26, %v1818_v5 }
 0xcd3   :  { %v1871_v6 = vadd.f32 %v1870_v28, %v1864_v56 }
 0xcd5   :  { %v1872_v44 = vadd.f32 %v1871_v6, %v1867_v62 }
 0xcd7   :  { %v1873_v17 = vrot.slane %v1872_v44, 4 }
 0xcd9   :  { %v1874_v1 = vadd.f32 %v1873_v17, %v1872_v44 }
 0xcdb   :  { %v1875_v30 = vrot.slane %v1874_v1, 2 }
 0xcdd   :  { %v1876_v24 = vadd.f32 %v1875_v30, %v1874_v1 }
 0xcdf   :  { %v1877_v49 = vrot.slane %v1876_v24, 1 }
 0xce1   :  { %v1878_v41 = vadd.f32 %v1877_v49, %v1876_v24 }
 0xce3   :  { %3808 = vmatmul.mubr.f32.vlgmr.msra.gmra.mxu0 %v1878_v41  ;;  %v5218_v41 = vld [vmem:[%s5483_s5 + $0x1] sm:$0x1] }
 0xce4   :  { %3849 = vmatprep.mubr.msk.bf16.mxu0 %vm235_vm1, %v4716_v14 }
 0xda3   :  { %v1945_v27 = vpop.f32.mrf.mxu0 }
 0xda4   :  { %v1949_v23 = vmul.f32 0.001953125, %v1945_v27 }
 0xda5   :  { %v3809_v58 = vpop.f32.mrf.mxu0 }
 0xda6   :  { %v1953_v9 = vrot.slane %v1949_v23, %v4580_v22 }
 0xda8   :  { %v1954_v10 = vsub.f32 %v1856_v3, %v1953_v9  ;;  %v1955_v61 = vsub.f32 %v1859_v4, %v1953_v9  ;;  %v1956_v26 = vsub.f32 %v1864_v56, %v1953_v9  ;;  %v1957_v28 = vsub.f32 %v1867_v62, %v1953_v9  ;;  %v5225_v9 = vld [vmem:[%s5484_s6 + $0x1] ss:$0 sm:$0xff] }
 0xdaa   :  { %v1958_v63 = vmul.f32 %v1954_v10, %v1954_v10  ;;  %v1959_v8 = vmul.f32 %v1955_v61, %v1955_v61  ;;  %v1960_v17 = vmul.f32 %v1956_v26, %v1956_v26  ;;  %v1961_v30 = vmul.f32 %v1957_v28, %v1957_v28 }
 0xdac   :  { %v1962_v43 = vadd.f32 %v1959_v8, %v1958_v63 }
 0xdae   :  { %v1963_v1 = vadd.f32 %v1962_v43, %v1960_v17 }
 0xdb0   :  { %v1964_v49 = vadd.f32 %v1963_v1, %v1961_v30 }
 0xdb2   :  { %v1965_v2 = vrot.slane %v1964_v49, 4 }
 0xdb4   :  { %v1966_v5 = vadd.f32 %v1965_v2, %v1964_v49 }
 0xdb6   :  { %v1967_v6 = vrot.slane %v1966_v5, 2 }
 0xdb8   :  { %v1968_v14 = vadd.f32 %v1967_v6, %v1966_v5 }
 0xdba   :  { %v1969_v44 = vrot.slane %v1968_v14, 1 }
 0xdbc   :  { %v1970_v24 = vadd.f32 %v1969_v44, %v1968_v14 }
 0xdbe   :  { %3843 = vmatmul.mubr.f32.vlgmr.msra.gmra.mxu1 %v1970_v24 }
 0xdbf   :  { %3276 = vmatpush3.bf16.msra.mxu1 %v4855_v11 }
 0xdc0   :  { %3277 = vmatprep.subr.bf16.mxu1 %v4860_v21 }
 0xdc3   :  { %3278 = vmatpush3.bf16.msra.mxu1 %v4867_v57 }
 0xdc4   :  { %3279 = vmatprep.subr.bf16.mxu1 %v4873_v13 }
 0xdc7   :  { %3280 = vmatpush3.bf16.msra.mxu1 %v4879_v20 }
 0xdc8   :  { %3281 = vmatprep.subr.bf16.mxu1 %v4885_v33 }
 0xdcb   :  { %3282 = vmatpush3.bf16.msra.mxu1 %v4891_v34 }
 0xdcc   :  { %3283 = vmatprep.subr.bf16.mxu1 %v4897_v35 }
 0xdcf   :  { %3284 = vmatpush3.bf16.msra.mxu1 %v4903_v36 }
 0xdd0   :  { %3285 = vmatprep.subr.bf16.mxu1 %v4909_v38 }
 0xdd3   :  { %3286 = vmatpush3.bf16.msra.mxu1 %v4915_v39 }
 0xdd4   :  { %3287 = vmatprep.subr.bf16.mxu1 %v4989_v0 }
 0xdd7   :  { %3288 = vmatpush3.bf16.msra.mxu1 %v4994_v25 }
 0xdd8   :  { %3289 = vmatprep.subr.bf16.mxu1 %v5008_v47 }
 0xddb   :  { %3290 = vmatpush3.bf16.msra.mxu1 %v5013_v29 }
 0xddc   :  { %3877 = vmatprep.subr.mxu1 %v5569_v18 }
 0xe7e   :  { %v2037_v62 = vpop.f32.mrf.mxu1 }
 0xe7f   :  { %v2041_v56 = vmul.f32 0.001953125, %v2037_v62 }
 0xe80   :  { %v3844_v3 = vpop.f32.mrf.mxu1 }
 0xe81   :  { %v2042_v4 = vadd.f32 1e-05, %v2041_v56 }
 0xe83   :  { %4113 = vrsqrt.f32 %v2042_v4 }
 0xe90   :  { %v4114_v27 = vpop.eup %4113 }
 0xe91   :  { %v2044_v23 = vmul.f32 %v4114_v27, %v5218_v41 }
 0xe93   :  { %v2049_v58 = vrot.slane %v2044_v23, %v4580_v22 }
 0xe95   :  { %v2053_v63 = vmul.f32 %v2049_v58, %v1956_v26  ;;  %v2054_v8 = vmul.f32 %v2049_v58, %v1957_v28  ;;  %v2051_v17 = vmul.f32 %v2049_v58, %v1954_v10  ;;  %v2052_v43 = vmul.f32 %v2049_v58, %v1955_v61 }
 0xe97   :  { %v2063_v30 = vadd.f32 %v5225_v9, %v2053_v63  ;;  %v2064_v1 = vadd.f32 %v5225_v9, %v2054_v8  ;;  %v2061_v49 = vadd.f32 %v5225_v9, %v2051_v17  ;;  %v2062_v2 = vadd.f32 %v5225_v9, %v2052_v43 }
 0xe99   :  { %v2067_v5 = vmax.f32 %v2063_v30, 0.0  ;;  %v2068_v6 = vmax.f32 %v2064_v1, 0.0  ;;  %v2065_v14 = vmax.f32 %v2061_v49, 0.0  ;;  %v2066_v44 = vmax.f32 %v2062_v2, 0.0  ;;  %v5601_v49 = vld [vmem:[#allocation8_spill] sm:$0xff]  ;;  %v5602_v2 = vld [vmem:[#allocation9_spill] sm:$0xff] }
 0xe9b   :  { %v2071_v24 = vadd.f32 %v2067_v5, %v4925_v12  ;;  %v2072_v62 = vadd.f32 %v2068_v6, %v4927_v19  ;;  %v2069_v26 = vadd.f32 %v2065_v14, %v4929_v15  ;;  %v2070_v10 = vadd.f32 %v2066_v44, %v4931_v55  ;;  %v5603_v5 = vld [vmem:[#allocation10_spill] sm:$0xff]  ;;  %v5604_v6 = vld [vmem:[#allocation11_spill] sm:$0xff]  ;;  %v5605_v14 = vld [vmem:[#allocation12_spill] sm:$0xff] }
 0xe9c   :  { %v5606_v44 = vld [vmem:[#allocation13_spill] sm:$0xff] }
 0xe9d   :  { %v2074_v61 = vpack.c.bf16 %v2072_v62, %v2071_v24  ;;  %v2073_v28 = vpack.c.bf16 %v2070_v10, %v2069_v26  ;;  %v5607_v24 = vld [vmem:[#allocation14_spill] sm:$0xff]  ;;  %v5608_v62 = vld [vmem:[#allocation15_spill] sm:$0xff]  ;;  %v5609_v26 = vld [vmem:[#allocation16_spill] sm:$0xff] }
 0xe9e   :  { %v5610_v10 = vld [vmem:[#allocation17_spill] sm:$0xff] }
 0xe9f   :  { %3845 = vmatprep.subr.bf16.mxu0 %v2074_v61  ;;  %2176 = vmatprep.mubr.bf16.mxu1 %v2073_v28 }
 0xea0   :  { %3846 = vmatpush3.bf16.msra.mxu0 %v2074_v61 }
 0xea1   :  { %3847 = vmatprep.subr.bf16.mxu0 %v2073_v28 }
 0xea4   :  { %3848 = vmatpush3.bf16.msra.mxu0 %v2073_v28  ;;  %v5612_v28 = vld [vmem:[#allocation7_spill] sm:$0xff] }
 0xea5   :  { %3857 = vmatprep.subr.bf16.mxu0 %v4940_v16 }
 0xea7   :  { %3850 = vmatmul.mubr.msk.bf16.vlgmr.msra.gmra.mxu0 %vm235_vm1, %v4951_v54 }
 0xea8   :  { %3853 = vmatprep.mubr.msk.bf16.mxu0 %vm235_vm1, %v4958_v31  ;;  %3858 = vmatpush3.bf16.msra.mxu0 %v4940_v16 }
 0xea9   :  { %3859 = vmatprep.subr.bf16.mxu0 %v4946_v60 }
 0xeac   :  { %3860 = vmatpush3.bf16.msra.mxu0 %v4946_v60 }
 0xead   :  { %3861 = vmatprep.subr.bf16.mxu0 %v4967_v32 }
 0xeaf   :  { %3854 = vmatmul.mubr.msk.bf16.gmra.mxu0 %vm235_vm1, %v4979_v59 }
 0xeb0   :  { %3862 = vmatpush3.bf16.msra.mxu0 %v4967_v32 }
 0xeb1   :  { %3863 = vmatprep.subr.bf16.mxu0 %v4974_v37 }
 0xeb4   :  { %3864 = vmatpush3.bf16.msra.mxu0 %v4974_v37 }
 0xeb5   :  { %3865 = vmatprep.subr.bf16.mxu0 %v4999_v53 }
 0xeb8   :  { %3866 = vmatpush3.bf16.msra.mxu0 %v4999_v53 }
 0xeb9   :  { %3867 = vmatprep.subr.bf16.mxu0 %v5018_v50 }
 0xebc   :  { %3868 = vmatpush3.bf16.msra.mxu0 %v5018_v50 }
 0xebd   :  { %3869 = vmatprep.subr.bf16.mxu0 %v5028_v51 }
 0xec0   :  { %3870 = vmatpush3.bf16.msra.mxu0 %v5028_v51 }
 0xec1   :  { %3871 = vmatprep.subr.bf16.mxu0 %v5035_v52 }
 0xec4   :  { %3872 = vmatpush3.bf16.msra.mxu0 %v5035_v52 }
 0xec5   :  { %3912 = vmatprep.subr.mxu0 %v5569_v18 }
 0xf67   :  { %v3851_v56 = vpop.f32.mrf.mxu0 }
 0xf69   :  { %v2109_v3 = vpop.f32.mrf.mxu0 }
 0xf6b   :  { %v3852_v4 = vpop.f32.mrf.mxu0 }
 0xf6c   :  { %v2141_v43 = vpack.c.bf16 %v3852_v4, %v3851_v56 }
 0xf6d   :  { %v2112_v27 = vpop.f32.mrf.mxu0 }
 0xf6e   :  { %v2140_v23 = vpack.c.bf16 %v2112_v27, %v2109_v3 }
 0xf6f   :  { %v3855_v58 = vpop.f32.mrf.mxu0 }
 0xf70   :  { %2177 = vmatmul.mubr.bf16.vlgmr.msra.gmra.mxu1 %v2140_v23 }
 0xf71   :  { %v2125_v63 = vpop.f32.mrf.mxu0  ;;  %2184 = vmatprep.mubr.bf16.mxu1 %v2074_v61  ;;  %3878 = vmatpush3.msra.mxu1 %v5043_v7  ;;  %v5611_v61 = vld [vmem:[#allocation18_spill] sm:$0xff] }
 0xf72   :  { %3879 = vmatprep.subr.mxu1 %v5569_v18 }
 0xf73   :  { %v3856_v8 = vpop.f32.mrf.mxu0  ;;  %3880 = vmatpush3.msra.mxu1 %v5050_v40 }
 0xf74   :  { %3881 = vmatprep.subr.mxu1 %v5569_v18  ;;  %v2143_v1 = vpack.c.bf16 %v3856_v8, %v3855_v58 }
 0xf75   :  { %v2128_v17 = vpop.f32.mrf.mxu0  ;;  %3882 = vmatpush3.msra.mxu1 %v5057_v42 }
 0xf76   :  { %v2142_v30 = vpack.c.bf16 %v2128_v17, %v2125_v63  ;;  %3883 = vmatprep.subr.mxu1 %v5569_v18 }
 0xf77   :  { %3884 = vmatpush3.msra.mxu1 %v5064_v46 }
 0xf78   :  { %2185 = vmatmul.mubr.bf16.gmra.mxu1 %v2141_v43  ;;  %3873 = vmatprep.mubr.bf16.mxu0 %v2142_v30 }
 0xf79   :  { %3874 = vmatmul.mubr.bf16.vlgmr.msra.gmra.mxu0 %v2143_v1  ;;  %3885 = vmatprep.subr.mxu1 %v5569_v18 }
 0xf7a   :  { %3886 = vmatpush3.msra.mxu1 %v5071_v48  ;;  %3909 = vmatprep.mubr.msk.f32.mxu1 %vm4145_vm2, %v5569_v18 }
 0xf7b   :  { %3887 = vmatprep.subr.mxu1 %v5569_v18  ;;  %3913 = vmatpush3.msra.mxu0 %v5043_v7 }
 0xf7c   :  { %3888 = vmatpush3.msra.mxu1 %v5601_v49  ;;  %3914 = vmatprep.subr.mxu0 %v5569_v18 }
 0xf7d   :  { %3889 = vmatprep.subr.mxu1 %v5569_v18  ;;  %3915 = vmatpush3.msra.mxu0 %v5050_v40 }
 0xf7e   :  { %3890 = vmatpush3.msra.mxu1 %v5602_v2  ;;  %3916 = vmatprep.subr.mxu0 %v5569_v18 }
 0xf7f   :  { %3891 = vmatprep.subr.mxu1 %v5569_v18  ;;  %3917 = vmatpush3.msra.mxu0 %v5057_v42 }
 0xf80   :  { %3892 = vmatpush3.msra.mxu1 %v5603_v5  ;;  %3918 = vmatprep.subr.mxu0 %v5569_v18 }
 0xf81   :  { %3893 = vmatprep.subr.mxu1 %v5569_v18  ;;  %3919 = vmatpush3.msra.mxu0 %v5064_v46 }
 0xf82   :  { %3894 = vmatpush3.msra.mxu1 %v5604_v6  ;;  %3920 = vmatprep.subr.mxu0 %v5569_v18 }
 0xf83   :  { %3895 = vmatprep.subr.mxu1 %v5569_v18  ;;  %3921 = vmatpush3.msra.mxu0 %v5071_v48 }
 0xf84   :  { %3896 = vmatpush3.msra.mxu1 %v5605_v14  ;;  %3922 = vmatprep.subr.mxu0 %v5569_v18 }
 0xf85   :  { %3897 = vmatprep.subr.mxu1 %v5569_v18  ;;  %3923 = vmatpush3.msra.mxu0 %v5601_v49 }
 0xf86   :  { %3898 = vmatpush3.msra.mxu1 %v5606_v44  ;;  %3924 = vmatprep.subr.mxu0 %v5569_v18 }
 0xf87   :  { %3899 = vmatprep.subr.mxu1 %v5569_v18  ;;  %3925 = vmatpush3.msra.mxu0 %v5602_v2 }
 0xf88   :  { %3900 = vmatpush3.msra.mxu1 %v5607_v24  ;;  %3926 = vmatprep.subr.mxu0 %v5569_v18 }
 0xf89   :  { %3901 = vmatprep.subr.mxu1 %v5569_v18  ;;  %3927 = vmatpush3.msra.mxu0 %v5603_v5 }
 0xf8a   :  { %3902 = vmatpush3.msra.mxu1 %v5608_v62  ;;  %3928 = vmatprep.subr.mxu0 %v5569_v18 }
 0xf8b   :  { %3903 = vmatprep.subr.mxu1 %v5569_v18  ;;  %3929 = vmatpush3.msra.mxu0 %v5604_v6 }
 0xf8c   :  { %3904 = vmatpush3.msra.mxu1 %v5609_v26  ;;  %3930 = vmatprep.subr.mxu0 %v5569_v18 }
 0xf8d   :  { %3905 = vmatprep.subr.mxu1 %v5569_v18  ;;  %3931 = vmatpush3.msra.mxu0 %v5605_v14 }
 0xf8e   :  { %3906 = vmatpush3.msra.mxu1 %v5610_v10  ;;  %3932 = vmatprep.subr.mxu0 %v5569_v18 }
 0xf8f   :  { %3907 = vmatprep.subr.mxu1 %v5569_v18  ;;  %3933 = vmatpush3.msra.mxu0 %v5606_v44 }
 0xf90   :  { %3908 = vmatpush3.msra.mxu1 %v5611_v61  ;;  %3934 = vmatprep.subr.mxu0 %v5569_v18 }
 0xf91   :  { %3935 = vmatpush3.msra.mxu0 %v5607_v24  ;;  %3944 = vmatprep.mubr.msk.f32.mxu0 %vm4145_vm2, %v5569_v18 }
 0xf92   :  { %3936 = vmatprep.subr.mxu0 %v5569_v18 }
 0xf93   :  { %3937 = vmatpush3.msra.mxu0 %v5608_v62 }
 0xf94   :  { %3938 = vmatprep.subr.mxu0 %v5569_v18 }
 0xf95   :  { %3939 = vmatpush3.msra.mxu0 %v5609_v26 }
 0xf96   :  { %3940 = vmatprep.subr.mxu0 %v5569_v18 }
 0xf97   :  { %3941 = vmatpush3.msra.mxu0 %v5610_v10 }
 0xf98   :  { %3942 = vmatprep.subr.mxu0 %v5569_v18 }
 0xf99   :  { %3943 = vmatpush3.msra.mxu0 %v5611_v61 }
 0xf9a   :  { %3353 = vmatprep.subr.bf16.mxu0 %v5612_v28 }
0x1030   :  { %v3291_v56 = vpop.f32.mrf.mxu1 }
0x1032   :  { %v3292_v3 = vpop.f32.mrf.mxu1 }
0x1033   :  { %v3293_v63 = vadd.f32 %v3292_v3, %v3291_v56 }
0x1034   :  { %v3294_v4 = vpop.f32.mrf.mxu1 }
0x1035   :  { %v2179_v62 = vadd.f32 %v3293_v63, %v5190_v45 }
0x1036   :  { %v3295_v27 = vpop.f32.mrf.mxu1 }
0x1037   :  { %v3296_v8 = vadd.f32 %v3295_v27, %v3294_v4 }
0x1038   :  { %v3297_v23 = vpop.f32.mrf.mxu1 }
0x1039   :  { %v3875_v58 = vpop.f32.mrf.mxu0  ;;  %v2182_v28 = vadd.f32 %v3296_v8, %v5190_v45 }
0x103a   :  { %v3298_v17 = vpop.f32.mrf.mxu1 }
0x103b   :  { %v3299_v43 = vadd.f32 %v3298_v17, %v3297_v23  ;;  %v2227_v30 = vpop.f32.mrf.mxu0 }
0x103c   :  { %v3300_v1 = vpop.f32.mrf.mxu1  ;;  %v2228_v14 = vadd.f32 %v2227_v30, %v2179_v62 }
0x103d   :  { %v3876_v26 = vpop.f32.mrf.mxu0  ;;  %v2187_v10 = vadd.f32 %v3299_v43, %v5190_v45 }
0x103e   :  { %v3301_v61 = vpop.f32.mrf.mxu1 }
0x103f   :  { %v3302_v24 = vadd.f32 %v3301_v61, %v3300_v1  ;;  %v2230_v44 = vpop.f32.mrf.mxu0  ;;  %v2236_v56 = vadd.f32 %v3875_v58, %v2187_v10  ;;  %v4143_v61 = vld [vmem:[%s5478_s7] sm:$0xff]  }
0x1040   :  { %v2231_v6 = vadd.f32 %v2230_v44, %v2182_v28 }
0x1041   :  { %v2190_v5 = vadd.f32 %v3302_v24, %v5190_v45 }
0x1042   :  { %v2242_v3 = vadd.f32 %v2231_v6, %v2228_v14 }
0x1043   :  { %v2239_v4 = vadd.f32 %v3876_v26, %v2190_v5 }
0x1044   :  { %v2243_v27 = vadd.f32 %v2242_v3, %v2236_v56 }
0x1046   :  { %v2244_v23 = vadd.f32 %v2243_v27, %v2239_v4 }
0x1048   :  { %v2245_v17 = vrot.slane %v2244_v23, 4 }
0x104a   :  { %v2246_v2 = vadd.f32 %v2245_v17, %v2244_v23 }
0x104c   :  { %v2247_v49 = vrot.slane %v2246_v2, 2 }
0x104e   :  { %v2248_v43 = vadd.f32 %v2247_v49, %v2246_v2 }
0x1050   :  { %v2249_v48 = vrot.slane %v2248_v43, 1 }
0x1052   :  { %v2250_v63 = vadd.f32 %v2249_v48, %v2248_v43 }
0x1054   :  { %3910 = vmatmul.mubr.f32.vlgmr.msra.gmra.mxu1 %v2250_v63 }
0x1055   :  { %3951 = vmatprep.mubr.msk.bf16.mxu1 %vm235_vm1, %v4143_v61 }
0x1114   :  { %v2317_v44 = vpop.f32.mrf.mxu1 }
0x1115   :  { %v2321_v24 = vmul.f32 0.001953125, %v2317_v44 }
0x1116   :  { %v3911_v62 = vpop.f32.mrf.mxu1 }
0x1117   :  { %v2325_v5 = vrot.slane %v2321_v24, %v4580_v22 }
0x1119   :  { %v2326_v26 = vsub.f32 %v2228_v14, %v2325_v5  ;;  %v2327_v10 = vsub.f32 %v2231_v6, %v2325_v5  ;;  %v2328_v58 = vsub.f32 %v2236_v56, %v2325_v5  ;;  %v2329_v8 = vsub.f32 %v2239_v4, %v2325_v5 }
0x111b   :  { %v2330_v30 = vmul.f32 %v2326_v26, %v2326_v26  ;;  %v2331_v49 = vmul.f32 %v2327_v10, %v2327_v10  ;;  %v2332_v2 = vmul.f32 %v2328_v58, %v2328_v58  ;;  %v2333_v1 = vmul.f32 %v2329_v8, %v2329_v8 }
0x111d   :  { %v2334_v48 = vadd.f32 %v2331_v49, %v2330_v30  ;;  %v5622_v30 = vld [vmem:[#allocation16_spill] sm:$0xff]  ;;  %v5623_v49 = vld [vmem:[#allocation17_spill] sm:$0xff] }
0x111f   :  { %v2335_v28 = vadd.f32 %v2334_v48, %v2332_v2  ;;  %v5624_v2 = vld [vmem:[#allocation18_spill] sm:$0xff] }
0x1121   :  { %v2336_v3 = vadd.f32 %v2335_v28, %v2333_v1 }
0x1123   :  { %v2337_v27 = vrot.slane %v2336_v3, 4 }
0x1125   :  { %v2338_v23 = vadd.f32 %v2337_v27, %v2336_v3 }
0x1127   :  { %v2339_v17 = vrot.slane %v2338_v23, 2 }
0x1129   :  { %v2340_v43 = vadd.f32 %v2339_v17, %v2338_v23 }
0x112b   :  { %v2341_v63 = vrot.slane %v2340_v43, 1 }
0x112d   :  { %v2342_v61 = vadd.f32 %v2341_v63, %v2340_v43 }
0x112f   :  { %3945 = vmatmul.mubr.f32.vlgmr.msra.gmra.mxu0 %v2342_v61 }
0x1130   :  { %3354 = vmatpush3.bf16.msra.mxu0 %v4855_v11 }
0x1131   :  { %3355 = vmatprep.subr.bf16.mxu0 %v4860_v21 }
0x1134   :  { %3356 = vmatpush3.bf16.msra.mxu0 %v4867_v57 }
0x1135   :  { %3357 = vmatprep.subr.bf16.mxu0 %v4873_v13 }
0x1138   :  { %3358 = vmatpush3.bf16.msra.mxu0 %v4879_v20 }
0x1139   :  { %3359 = vmatprep.subr.bf16.mxu0 %v4885_v33 }
0x113c   :  { %3360 = vmatpush3.bf16.msra.mxu0 %v4891_v34 }
0x113d   :  { %3361 = vmatprep.subr.bf16.mxu0 %v4897_v35 }
0x1140   :  { %3362 = vmatpush3.bf16.msra.mxu0 %v4903_v36 }
0x1141   :  { %3363 = vmatprep.subr.bf16.mxu0 %v4909_v38 }
0x1144   :  { %3364 = vmatpush3.bf16.msra.mxu0 %v4915_v39 }
0x1145   :  { %3365 = vmatprep.subr.bf16.mxu0 %v4989_v0 }
0x1148   :  { %3366 = vmatpush3.bf16.msra.mxu0 %v4994_v25 }
0x1149   :  { %3367 = vmatprep.subr.bf16.mxu0 %v5008_v47 }
0x114c   :  { %3368 = vmatpush3.bf16.msra.mxu0 %v5013_v29 }
0x114d   :  { %3979 = vmatprep.subr.mxu0 %v5569_v18 }
0x11ef   :  { %v2409_v11 = vpop.f32.mrf.mxu0 }
0x11f0   :  { %v2413_v21 = vmul.f32 0.001953125, %v2409_v11 }
0x11f1   :  { %v3946_v57 = vpop.f32.mrf.mxu0 }
0x11f2   :  { %v2414_v13 = vadd.f32 1e-05, %v2413_v21 }
0x11f4   :  { %4115 = vrsqrt.f32 %v2414_v13 }
0x1201   :  { %v4116_v20 = vpop.eup %4115 }
0x1202   :  { %v2416_v33 = vmul.f32 %v4116_v20, %v5218_v41 }
0x1204   :  { %v2421_v34 = vrot.slane %v2416_v33, %v4580_v22 }
0x1206   :  { %v2425_v35 = vmul.f32 %v2421_v34, %v2328_v58  ;;  %v2426_v36 = vmul.f32 %v2421_v34, %v2329_v8  ;;  %v2423_v38 = vmul.f32 %v2421_v34, %v2326_v26  ;;  %v2424_v39 = vmul.f32 %v2421_v34, %v2327_v10  ;;  %v5616_v58 = vld [vmem:[#allocation10_spill] sm:$0xff]  ;;  %v5621_v8 = vld [vmem:[#allocation15_spill] sm:$0xff] }
0x1208   :  { %v2429_v0 = vadd.f32 %v5225_v9, %v2425_v35  ;;  %v2430_v25 = vadd.f32 %v5225_v9, %v2426_v36  ;;  %v2427_v47 = vadd.f32 %v5225_v9, %v2423_v38  ;;  %v2428_v29 = vadd.f32 %v5225_v9, %v2424_v39 }
0x120a   :  { %v2433_v6 = vmax.f32 %v2429_v0, 0.0  ;;  %v2434_v14 = vmax.f32 %v2430_v25, 0.0  ;;  %v2431_v56 = vmax.f32 %v2427_v47, 0.0  ;;  %v2432_v4 = vmax.f32 %v2428_v29, 0.0 }
0x120c   :  { %v2437_v44 = vadd.f32 %v2433_v6, %v4925_v12  ;;  %v2438_v24 = vadd.f32 %v2434_v14, %v4927_v19  ;;  %v2435_v62 = vadd.f32 %v2431_v56, %v4929_v15  ;;  %v2436_v5 = vadd.f32 %v2432_v4, %v4931_v55 }
0x120e   :  { %v2440_v26 = vpack.c.bf16 %v2438_v24, %v2437_v44  ;;  %v2439_v10 = vpack.c.bf16 %v2436_v5, %v2435_v62 }
0x1210   :  { %3947 = vmatprep.subr.bf16.mxu1 %v2440_v26  ;;  %2542 = vmatprep.mubr.bf16.mxu0 %v2439_v10 }
0x1211   :  { %3948 = vmatpush3.bf16.msra.mxu1 %v2440_v26 }
0x1212   :  { %3949 = vmatprep.subr.bf16.mxu1 %v2439_v10 }
0x1215   :  { %3950 = vmatpush3.bf16.msra.mxu1 %v2439_v10 }
0x1216   :  { %3959 = vmatprep.subr.bf16.mxu1 %v4940_v16 }
0x1218   :  { %3952 = vmatmul.mubr.msk.bf16.vlgmr.msra.gmra.mxu1 %vm235_vm1, %v4951_v54 }
0x1219   :  { %3955 = vmatprep.mubr.msk.bf16.mxu1 %vm235_vm1, %v4958_v31  ;;  %3960 = vmatpush3.bf16.msra.mxu1 %v4940_v16 }
0x121a   :  { %3961 = vmatprep.subr.bf16.mxu1 %v4946_v60 }
0x121d   :  { %3962 = vmatpush3.bf16.msra.mxu1 %v4946_v60 }
0x121e   :  { %3963 = vmatprep.subr.bf16.mxu1 %v4967_v32 }
0x1220   :  { %3956 = vmatmul.mubr.msk.bf16.gmra.mxu1 %vm235_vm1, %v4979_v59 }
0x1221   :  { %3964 = vmatpush3.bf16.msra.mxu1 %v4967_v32 }
0x1222   :  { %3965 = vmatprep.subr.bf16.mxu1 %v4974_v37 }
0x1225   :  { %3966 = vmatpush3.bf16.msra.mxu1 %v4974_v37 }
0x1226   :  { %3967 = vmatprep.subr.bf16.mxu1 %v4999_v53 }
0x1229   :  { %3968 = vmatpush3.bf16.msra.mxu1 %v4999_v53 }
0x122a   :  { %3969 = vmatprep.subr.bf16.mxu1 %v5018_v50 }
0x122d   :  { %3970 = vmatpush3.bf16.msra.mxu1 %v5018_v50  ;;  %v5613_v50 = vld [vmem:[#allocation6_spill] sm:$0xff] }
0x122e   :  { %3971 = vmatprep.subr.bf16.mxu1 %v5028_v51 }
0x1231   :  { %3972 = vmatpush3.bf16.msra.mxu1 %v5028_v51  ;;  %v5614_v51 = vld [vmem:[#allocation8_spill] sm:$0xff] }
0x1232   :  { %3973 = vmatprep.subr.bf16.mxu1 %v5035_v52 }
0x1235   :  { %3974 = vmatpush3.bf16.msra.mxu1 %v5035_v52  ;;  %v5615_v52 = vld [vmem:[#allocation9_spill] sm:$0xff] }
0x1236   :  { %4014 = vmatprep.subr.mxu1 %v5569_v18 }
0x12d8   :  { %v3953_v12 = vpop.f32.mrf.mxu1 }
0x12da   :  { %v2475_v19 = vpop.f32.mrf.mxu1 }
0x12dc   :  { %v3954_v15 = vpop.f32.mrf.mxu1 }
0x12dd   :  { %v2507_v37 = vpack.c.bf16 %v3954_v15, %v3953_v12 }
0x12de   :  { %v2478_v55 = vpop.f32.mrf.mxu1 }
0x12df   :  { %v2506_v16 = vpack.c.bf16 %v2478_v55, %v2475_v19 }
0x12e0   :  { %v3957_v60 = vpop.f32.mrf.mxu1 }
0x12e1   :  { %2543 = vmatmul.mubr.bf16.vlgmr.msra.gmra.mxu0 %v2506_v16 }
0x12e2   :  { %v2491_v54 = vpop.f32.mrf.mxu1  ;;  %2550 = vmatprep.mubr.bf16.mxu0 %v2440_v26  ;;  %3980 = vmatpush3.msra.mxu0 %v5043_v7 }
0x12e3   :  { %3981 = vmatprep.subr.mxu0 %v5569_v18 }
0x12e4   :  { %v3958_v31 = vpop.f32.mrf.mxu1  ;;  %3982 = vmatpush3.msra.mxu0 %v5050_v40 }
0x12e5   :  { %3983 = vmatprep.subr.mxu0 %v5569_v18  ;;  %v2509_v53 = vpack.c.bf16 %v3958_v31, %v3957_v60 }
0x12e6   :  { %v2494_v32 = vpop.f32.mrf.mxu1  ;;  %3984 = vmatpush3.msra.mxu0 %v5057_v42 }
0x12e7   :  { %v2508_v59 = vpack.c.bf16 %v2494_v32, %v2491_v54  ;;  %3985 = vmatprep.subr.mxu0 %v5569_v18 }
0x12e8   :  { %3986 = vmatpush3.msra.mxu0 %v5064_v46 }
0x12e9   :  { %2551 = vmatmul.mubr.bf16.gmra.mxu0 %v2507_v37  ;;  %3975 = vmatprep.mubr.bf16.mxu1 %v2508_v59 }
0x12ea   :  { %3976 = vmatmul.mubr.bf16.vlgmr.msra.gmra.mxu1 %v2509_v53  ;;  %3987 = vmatprep.subr.mxu0 %v5569_v18 }
0x12eb   :  { %3988 = vmatpush3.msra.mxu0 %v5613_v50  ;;  %4011 = vmatprep.mubr.msk.f32.mxu0 %vm4145_vm2, %v5569_v18 }
0x12ec   :  { %3989 = vmatprep.subr.mxu0 %v5569_v18  ;;  %4015 = vmatpush3.msra.mxu1 %v5043_v7  ;;  %v5617_v7 = vld [vmem:[#allocation11_spill] sm:$0xff] }
0x12ed   :  { %3990 = vmatpush3.msra.mxu0 %v5614_v51  ;;  %4016 = vmatprep.subr.mxu1 %v5569_v18 }
0x12ee   :  { %3991 = vmatprep.subr.mxu0 %v5569_v18  ;;  %4017 = vmatpush3.msra.mxu1 %v5050_v40  ;;  %v5618_v40 = vld [vmem:[#allocation12_spill] sm:$0xff] }
0x12ef   :  { %3992 = vmatpush3.msra.mxu0 %v5615_v52  ;;  %4018 = vmatprep.subr.mxu1 %v5569_v18 }
0x12f0   :  { %3993 = vmatprep.subr.mxu0 %v5569_v18  ;;  %4019 = vmatpush3.msra.mxu1 %v5057_v42  ;;  %v5619_v42 = vld [vmem:[#allocation13_spill] sm:$0xff] }
0x12f1   :  { %3994 = vmatpush3.msra.mxu0 %v5616_v58  ;;  %4020 = vmatprep.subr.mxu1 %v5569_v18 }
0x12f2   :  { %3995 = vmatprep.subr.mxu0 %v5569_v18  ;;  %4021 = vmatpush3.msra.mxu1 %v5064_v46  ;;  %v5620_v46 = vld [vmem:[#allocation14_spill] sm:$0xff] }
0x12f3   :  { %3996 = vmatpush3.msra.mxu0 %v5617_v7  ;;  %4022 = vmatprep.subr.mxu1 %v5569_v18 }
0x12f4   :  { %3997 = vmatprep.subr.mxu0 %v5569_v18  ;;  %4023 = vmatpush3.msra.mxu1 %v5613_v50 }
0x12f5   :  { %3998 = vmatpush3.msra.mxu0 %v5618_v40  ;;  %4024 = vmatprep.subr.mxu1 %v5569_v18 }
0x12f6   :  { %3999 = vmatprep.subr.mxu0 %v5569_v18  ;;  %4025 = vmatpush3.msra.mxu1 %v5614_v51 }
0x12f7   :  { %4000 = vmatpush3.msra.mxu0 %v5619_v42  ;;  %4026 = vmatprep.subr.mxu1 %v5569_v18 }
0x12f8   :  { %4001 = vmatprep.subr.mxu0 %v5569_v18  ;;  %4027 = vmatpush3.msra.mxu1 %v5615_v52 }
0x12f9   :  { %4002 = vmatpush3.msra.mxu0 %v5620_v46  ;;  %4028 = vmatprep.subr.mxu1 %v5569_v18 }
0x12fa   :  { %4003 = vmatprep.subr.mxu0 %v5569_v18  ;;  %4029 = vmatpush3.msra.mxu1 %v5616_v58 }
0x12fb   :  { %4004 = vmatpush3.msra.mxu0 %v5621_v8  ;;  %4030 = vmatprep.subr.mxu1 %v5569_v18 }
0x12fc   :  { %4005 = vmatprep.subr.mxu0 %v5569_v18  ;;  %4031 = vmatpush3.msra.mxu1 %v5617_v7 }
0x12fd   :  { %4006 = vmatpush3.msra.mxu0 %v5622_v30  ;;  %4032 = vmatprep.subr.mxu1 %v5569_v18 }
0x12fe   :  { %4007 = vmatprep.subr.mxu0 %v5569_v18  ;;  %4033 = vmatpush3.msra.mxu1 %v5618_v40 }
0x12ff   :  { %4008 = vmatpush3.msra.mxu0 %v5623_v49  ;;  %4034 = vmatprep.subr.mxu1 %v5569_v18 }
0x1300   :  { %4009 = vmatprep.subr.mxu0 %v5569_v18  ;;  %4035 = vmatpush3.msra.mxu1 %v5619_v42 }
0x1301   :  { %4010 = vmatpush3.msra.mxu0 %v5624_v2  ;;  %4036 = vmatprep.subr.mxu1 %v5569_v18 }
0x1302   :  { %4037 = vmatpush3.msra.mxu1 %v5620_v46  ;;  %4046 = vmatprep.mubr.msk.f32.mxu1 %vm4145_vm2, %v5569_v18 }
0x1303   :  { %4038 = vmatprep.subr.mxu1 %v5569_v18 }
0x1304   :  { %4039 = vmatpush3.msra.mxu1 %v5621_v8 }
0x1305   :  { %4040 = vmatprep.subr.mxu1 %v5569_v18 }
0x1306   :  { %4041 = vmatpush3.msra.mxu1 %v5622_v30 }
0x1307   :  { %4042 = vmatprep.subr.mxu1 %v5569_v18 }
0x1308   :  { %4043 = vmatpush3.msra.mxu1 %v5623_v49 }
0x1309   :  { %4044 = vmatprep.subr.mxu1 %v5569_v18 }
0x130a   :  { %4045 = vmatpush3.msra.mxu1 %v5624_v2 }
0x13a1   :  { %v3369_v48 = vpop.f32.mrf.mxu0 }
0x13a3   :  { %v3370_v1 = vpop.f32.mrf.mxu0 }
0x13a4   :  { %v3371_v17 = vadd.f32 %v3370_v1, %v3369_v48 }
0x13a5   :  { %v3372_v28 = vpop.f32.mrf.mxu0 }
0x13a6   :  { %v2545_v20 = vadd.f32 %v3371_v17, %v5190_v45 }
0x13a7   :  { %v3373_v3 = vpop.f32.mrf.mxu0 }
0x13a8   :  { %v3374_v43 = vadd.f32 %v3373_v3, %v3372_v28 }
0x13a9   :  { %v3375_v27 = vpop.f32.mrf.mxu0 }
0x13aa   :  { %v3977_v23 = vpop.f32.mrf.mxu1  ;;  %v2548_v33 = vadd.f32 %v3374_v43, %v5190_v45 }
0x13ab   :  { %v3376_v63 = vpop.f32.mrf.mxu0 }
0x13ac   :  { %v3377_v61 = vadd.f32 %v3376_v63, %v3375_v27  ;;  %v2593_v11 = vpop.f32.mrf.mxu1 }
0x13ad   :  { %v3378_v21 = vpop.f32.mrf.mxu0  ;;  %v2594_v36 = vadd.f32 %v2593_v11, %v2545_v20  ;;  %v5627_v20 = vld [vmem:[#allocation2_spill] sm:$0xff] }
0x13ae   :  { %v3978_v57 = vpop.f32.mrf.mxu1  ;;  %v2553_v13 = vadd.f32 %v3377_v61, %v5190_v45 }
0x13af   :  { %v3379_v18 = vpop.f32.mrf.mxu0 }
0x13b0   :  { %v3380_v34 = vadd.f32 %v3379_v18, %v3378_v21  ;;  %v2596_v35 = vpop.f32.mrf.mxu1  ;;  %v2602_v0 = vadd.f32 %v3977_v23, %v2553_v13  ;;  %v5626_v13 = vld [vmem:[#allocation5_spill] sm:$0xff] }
0x13b1   :  { %v2597_v38 = vadd.f32 %v2596_v35, %v2548_v33  ;;  %v5628_v33 = vld [vmem:[#allocation3_spill] sm:$0xff] }
0x13b2   :  { %v2556_v39 = vadd.f32 %v3380_v34, %v5190_v45 }
0x13b3   :  { %v2608_v25 = vadd.f32 %v2597_v38, %v2594_v36 }
0x13b4   :  { %v2605_v47 = vadd.f32 %v3978_v57, %v2556_v39  ;;  %v5625_v57 = vld [vmem:[#allocation4_spill] sm:$0xff] }
0x13b5   :  { %v2609_v29 = vadd.f32 %v2608_v25, %v2602_v0 }
0x13b7   :  { %v2610_v6 = vadd.f32 %v2609_v29, %v2605_v47 }
0x13b9   :  { %v2611_v14 = vrot.slane %v2610_v6, 4 }
0x13bb   :  { %v2612_v56 = vadd.f32 %v2611_v14, %v2610_v6 }
0x13bd   :  { %v2613_v4 = vrot.slane %v2612_v56, 2 }
0x13bf   :  { %v2614_v44 = vadd.f32 %v2613_v4, %v2612_v56 }
0x13c1   :  { %v2615_v24 = vrot.slane %v2614_v44, 1 }
0x13c3   :  { %v2616_v62 = vadd.f32 %v2615_v24, %v2614_v44 }
0x13c5   :  { %4012 = vmatmul.mubr.f32.vlgmr.msra.gmra.mxu0 %v2616_v62 }
0x1485   :  { %v2683_v5 = vpop.f32.mrf.mxu0 }
0x1486   :  { %v2687_v26 = vmul.f32 0.001953125, %v2683_v5 }
0x1487   :  { %v4013_v10 = vpop.f32.mrf.mxu0 }
0x1488   :  { %v2691_v12 = vrot.slane %v2687_v26, %v4580_v22 }
0x148a   :  { %v2692_v19 = vsub.f32 %v2594_v36, %v2691_v12  ;;  %v2693_v15 = vsub.f32 %v2597_v38, %v2691_v12  ;;  %v2694_v45 = vsub.f32 %v2602_v0, %v2691_v12  ;;  %v2695_v55 = vsub.f32 %v2605_v47, %v2691_v12 }
0x148c   :  { %v2696_v16 = vmul.f32 %v2692_v19, %v2692_v19  ;;  %v2697_v60 = vmul.f32 %v2693_v15, %v2693_v15  ;;  %v2698_v54 = vmul.f32 %v2694_v45, %v2694_v45  ;;  %v2699_v32 = vmul.f32 %v2695_v55, %v2695_v55 }
0x148e   :  { %v2700_v31 = vadd.f32 %v2697_v60, %v2696_v16 }
0x1490   :  { %v2701_v37 = vadd.f32 %v2700_v31, %v2698_v54 }
0x1492   :  { %v2702_v59 = vadd.f32 %v2701_v37, %v2699_v32 }
0x1494   :  { %v2703_v53 = vrot.slane %v2702_v59, 4 }
0x1496   :  { %v2704_v50 = vadd.f32 %v2703_v53, %v2702_v59 }
0x1498   :  { %v2705_v51 = vrot.slane %v2704_v50, 2 }
0x149a   :  { %v2706_v52 = vadd.f32 %v2705_v51, %v2704_v50 }
0x149c   :  { %v2707_v58 = vrot.slane %v2706_v52, 1 }
0x149e   :  { %v2708_v7 = vadd.f32 %v2707_v58, %v2706_v52 }
0x14a0   :  { %4047 = vmatmul.mubr.f32.vlgmr.msra.gmra.mxu1 %v2708_v7 }
0x1560   :  { %v2775_v40 = vpop.f32.mrf.mxu1 }
0x1561   :  { %v2779_v42 = vmul.f32 0.001953125, %v2775_v40 }
0x1562   :  { %v4048_v46 = vpop.f32.mrf.mxu1 }
0x1563   :  { %v2780_v8 = vadd.f32 1e-05, %v2779_v42 }
0x1565   :  { %4117 = vrsqrt.f32 %v2780_v8 }
0x1572   :  { %v4118_v30 = vpop.eup %4117 }
0x1573   :  { %v2782_v49 = vmul.f32 %v4118_v30, %v5218_v41 }
0x1575   :  { %v2787_v2 = vrot.slane %v2782_v49, %v4580_v22 }
0x1577   :  { %v2789_v48 = vmul.f32 %v2787_v2, %v2692_v19  ;;  %v2790_v1 = vmul.f32 %v2787_v2, %v2693_v15  ;;  %v2791_v28 = vmul.f32 %v2787_v2, %v2694_v45  ;;  %v2792_v3 = vmul.f32 %v2787_v2, %v2695_v55 }
0x1579   :  { %v2793_v27 = vadd.f32 %v5225_v9, %v2789_v48  ;;  %v2794_v23 = vadd.f32 %v5225_v9, %v2790_v1  ;;  %v2795_v17 = vadd.f32 %v5225_v9, %v2791_v28  ;;  %v2796_v43 = vadd.f32 %v5225_v9, %v2792_v3 }
0x157b   :  { %v2797_v63 = vmax.f32 %v2793_v27, 0.0  ;;  %v2798_v61 = vmax.f32 %v2794_v23, 0.0  ;;  %v2799_v11 = vmax.f32 %v2795_v17, 0.0  ;;  %v2800_v21 = vmax.f32 %v2796_v43, 0.0 }
0x157d   :  { %v2801_v41 = vadd.f32 %v2797_v63, %v5625_v57  ;;  %v2802_v22 = vadd.f32 %v2798_v61, %v5626_v13  ;;  %v2803_v18 = vadd.f32 %v2799_v11, %v5627_v20  ;;  %v2804_v34 = vadd.f32 %v2800_v21, %v5628_v33 }
0x157f   :  { %2805 = vst [vmem:[%s5485_s9] sm:$0xff] %v2801_v41  ;;  %2806 = vst [vmem:[%s5485_s9 + $0x8] sm:$0xff] %v2802_v22 }
0x1580   :  { %2807 = vst [vmem:[%s5485_s9 + $0x10] sm:$0xff] %v2803_v18  ;;  %2808 = vst [vmem:[%s5485_s9 + $0x18] sm:$0xff] %v2804_v34 }

</bundles_post_ra>
